<compile_context>
chip_gen: v7x
topology: tpu7x:2x2x1
jax: 0.10.0
libtpu: 0.0.40
codegen_flags: <defaults>
</compile_context>

<pallas_src>
import functools

import jax
import jax.numpy as jnp
from jax.experimental import pallas as pl
from jax.experimental.pallas import tpu as pltpu

# ----------------------------- config ---------------------------------------
D_MODEL = 128
VOCAB = 13
VOCAB_PAD = 128          # pad vocab dim to one full lane width
MAX_SEQ_LEN = 32
B = 2
T = 8

assert VOCAB <= VOCAB_PAD, "VOCAB_PAD must cover the vocabulary"
assert D_MODEL % 128 == 0 and MAX_SEQ_LEN % 8 == 0, "tile-alignment assumptions broken"


# ------------------------- fused Pallas kernel -------------------------------
def fused_forward_kernel(tok_ids_ref, lens_ref,            # SMEM: (N,) i32, (B,) i32
                         tok_emb_ref, pos_emb_ref, w_ref,  # VMEM weight tables
                         loss_ref, logits_ref,             # outputs: SMEM (1,1), VMEM (N,Vpad)
                         oh_tok_ref, woh_ref,              # VMEM scratch (N,Vpad) x2
                         *, batch, seq_len, compute_loss):
    n_rows = batch * seq_len
    lane = jax.lax.broadcasted_iota(jnp.int32, (1, VOCAB_PAD), 1)

    # Build the one-hot selector rows (and the mask-weighted target one-hot)
    # directly from SMEM scalars — no lane-width-1 VMEM inputs, no XLA gather.
    for b in range(batch):
        for t in range(seq_len):
            n = b * seq_len + t
            tid = tok_ids_ref[n]
            oh_tok_ref[pl.ds(n, 1), :] = (lane == tid).astype(jnp.float32)
            if compute_loss:
                if t < seq_len - 1:
                    # mask = (t >= input_lens[b]) & (t < T-1); shift folded in:
                    # target for row (b, t) is token_ids[b, t+1].
                    msk = (lens_ref[b] <= t).astype(jnp.float32)
                    woh_ref[pl.ds(n, 1), :] = jnp.where(
                        lane == tok_ids_ref[n + 1], msk, 0.0)
                else:
                    woh_ref[pl.ds(n, 1), :] = jnp.zeros((1, VOCAB_PAD), jnp.float32)

    # 1) token embedding gather as a one-hot matmul (exact at HIGHEST precision)
    hidden = jnp.dot(oh_tok_ref[...], tok_emb_ref[...],
                     preferred_element_type=jnp.float32,
                     precision=jax.lax.Precision.HIGHEST)          # (N, D)
    # 2) positional embedding add (rows 0..T-1, tiled over the batch)
    pos_block = pos_emb_ref[0:seq_len, :]                          # (T, D) static slice
    hidden = hidden + jnp.concatenate([pos_block] * batch, axis=0) # (N, D)

    # TODO(synk): TransComputer backbone not provided -> identity pass-through.

    # 3) lm_head (lane-dense 128-wide padded vocab; pad cols of w are zero)
    logits = jnp.dot(hidden, w_ref[...],
                     preferred_element_type=jnp.float32,
                     precision=jax.lax.Precision.HIGHEST)          # (N, Vpad)
    logits_ref[...] = logits

    # 4) masked cross-entropy (skipped entirely on the inference variant)
    if compute_loss:
        valid = lane < VOCAB
        masked_logits = jnp.where(valid, logits, jnp.float32(-1e30))
        m = jnp.max(masked_logits, axis=-1, keepdims=True)                    # (N,1)
        lse = m + jnp.log(jnp.sum(jnp.exp(masked_logits - m),
                                  axis=-1, keepdims=True))                    # (N,1)
        woh = woh_ref[...]                                                    # (N,Vpad)
        mask_col = jnp.sum(woh, axis=-1, keepdims=True)                       # (N,1) == mask
        loss_sum = jnp.sum(lse * mask_col) - jnp.sum(logits * woh)
        cnt = jnp.sum(mask_col)
        loss_ref[0, 0] = loss_sum / jnp.maximum(cnt, 1.0)
    else:
        loss_ref[0, 0] = jnp.float32(0.0)
    del n_rows


def fused_embed_lmhead_ce(tok_ids_flat, input_lens, tok_emb_pad, pos_emb, w_t_pad,
                          *, batch, seq_len, compute_loss):
    """tok_ids_flat: (N,) i32, input_lens: (B,) i32, tables pre-padded f32.
       -> (loss scalar f32, padded logits (N, VOCAB_PAD) f32)"""
    n_rows = batch * seq_len
    kern = functools.partial(fused_forward_kernel, batch=batch, seq_len=seq_len,
                             compute_loss=compute_loss)
    flops = 2 * n_rows * VOCAB_PAD * D_MODEL * 2            # gather matmul + lm_head
    transcendentals = (n_rows * VOCAB_PAD + n_rows) if compute_loss else 0
    bytes_accessed = 4 * (tok_emb_pad.size + pos_emb.size + w_t_pad.size
                          + n_rows * VOCAB_PAD + n_rows + batch + 1)

    loss, logits_pad = pl.pallas_call(
        kern,
        out_shape=(jax.ShapeDtypeStruct((1, 1), jnp.float32),
                   jax.ShapeDtypeStruct((n_rows, VOCAB_PAD), jnp.float32)),
        in_specs=[pl.BlockSpec(memory_space=pltpu.MemorySpace.SMEM),   # token_ids
                  pl.BlockSpec(memory_space=pltpu.MemorySpace.SMEM),   # input_lens
                  pl.BlockSpec(memory_space=pltpu.MemorySpace.VMEM),   # tok_emb_pad
                  pl.BlockSpec(memory_space=pltpu.MemorySpace.VMEM),   # pos_emb
                  pl.BlockSpec(memory_space=pltpu.MemorySpace.VMEM)],  # lm_head w^T pad
        out_specs=(pl.BlockSpec(memory_space=pltpu.MemorySpace.SMEM),  # loss scalar
                   pl.BlockSpec(memory_space=pltpu.MemorySpace.VMEM)), # padded logits
        scratch_shapes=[pltpu.VMEM((n_rows, VOCAB_PAD), jnp.float32),  # one-hot tokens
                        pltpu.VMEM((n_rows, VOCAB_PAD), jnp.float32)], # mask-weighted tgt one-hot
        cost_estimate=pl.CostEstimate(flops=flops,
                                      transcendentals=transcendentals,
                                      bytes_accessed=bytes_accessed),
    )(tok_ids_flat, input_lens, tok_emb_pad, pos_emb, w_t_pad)
    return loss[0, 0], logits_pad


# --------------------------- model params ------------------------------------
def init_params(key):
    k_tok, k_pos, k_lm = jax.random.split(key, 3)
    token_embedding = 0.02 * jax.random.normal(k_tok, (VOCAB, D_MODEL), jnp.float32)
    pos_embedding = 0.02 * jax.random.normal(k_pos, (MAX_SEQ_LEN, D_MODEL), jnp.float32)
    lm_head_w = 0.02 * jax.random.normal(k_lm, (VOCAB, D_MODEL), jnp.float32)
    # One-time preprocessing so no pad/transpose appears on the forward path.
    token_embedding_pad = jnp.zeros((VOCAB_PAD, D_MODEL), jnp.float32).at[:VOCAB].set(token_embedding)
    lm_head_w_t_pad = jnp.zeros((D_MODEL, VOCAB_PAD), jnp.float32).at[:, :VOCAB].set(lm_head_w.T)
    return {
        "token_embedding": token_embedding,        # pure-JAX reference only
        "pos_embedding": pos_embedding,
        "lm_head_w": lm_head_w,                    # pure-JAX reference only
        "token_embedding_pad": token_embedding_pad,
        "lm_head_w_t_pad": lm_head_w_t_pad,
    }


# --------------------------- model forward -----------------------------------
def arithmetic_model_forward(params, token_ids, op_ids, input_lens,
                             compute_steps=3, return_loss=True):
    # TODO(synk): op_ids / compute_steps drive the TransComputer backbone, which
    # was not provided with the module; identity pass-through is used instead.
    del op_ids, compute_steps
    bsz, tlen = token_ids.shape
    n_rows = bsz * tlen

    loss, logits_pad = fused_embed_lmhead_ce(
        token_ids.reshape(n_rows).astype(jnp.int32),
        input_lens.astype(jnp.int32),
        params["token_embedding_pad"],
        params["pos_embedding"],
        params["lm_head_w_t_pad"],
        batch=bsz, seq_len=tlen, compute_loss=return_loss)

    # Free reshape (no copy) — logits stay lane-dense until materialized.
    logits_full_pad = logits_pad.reshape(bsz, tlen, VOCAB_PAD)

    if not return_loss:
        # Slice to the real vocab only when materializing the API result.
        return logits_full_pad[:, :, :VOCAB]

    logits_shifted = logits_full_pad[:, :-1, :VOCAB]                 # (B, T-1, V) contract
    mask = (jnp.arange(tlen - 1, dtype=jnp.int32)[None, :]
            >= input_lens[:, None])                                  # (B, T-1) bool
    return loss, logits_shifted, mask


# ------------------------------ main ------------------------------------------
if __name__ == "__main__":
    key = jax.random.PRNGKey(0)
    kp, kt, ko = jax.random.split(key, 3)

    params = init_params(kp)
    token_ids = jax.random.randint(kt, (B, T), 0, VOCAB, dtype=jnp.int32)
    op_ids = jax.random.randint(ko, (B,), 0, 3, dtype=jnp.int32)
    input_lens = jnp.array([4, 5], dtype=jnp.int32)

    # Training path (loss + shifted logits + mask) and inference path (logits only).
    loss, logits_shifted, mask = arithmetic_model_forward(
        params, token_ids, op_ids, input_lens, compute_steps=3, return_loss=True)
    logits_infer = arithmetic_model_forward(
        params, token_ids, op_ids, input_lens, compute_steps=3, return_loss=False)
    jax.block_until_ready((loss, logits_shifted, mask, logits_infer))

    # Pure-JAX reference for the fused hot path.
    x = jnp.take(params["token_embedding"], token_ids, axis=0)
    pos_emb = jnp.take(params["pos_embedding"], jnp.arange(T), axis=0)[None]
    hidden_ref = x + pos_emb
    logits_ref = jnp.einsum("btd,vd->btv", hidden_ref, params["lm_head_w"],
                            precision=jax.lax.Precision.HIGHEST)
    targets = token_ids[:, 1:]
    ls_ref = logits_ref[:, :-1, :]
    mask_ref = jnp.arange(T - 1)[None, :] >= input_lens[:, None]
    logp = jax.nn.log_softmax(ls_ref, axis=-1)
    nll = -jnp.take_along_axis(logp, targets[..., None], axis=-1)[..., 0]
    fm = mask_ref.astype(jnp.float32)
    loss_ref = (nll * fm).sum() / jnp.maximum(fm.sum(), 1.0)

    assert jnp.allclose(logits_shifted, ls_ref, atol=1e-4, rtol=1e-4)
    assert jnp.allclose(logits_infer, logits_ref, atol=1e-4, rtol=1e-4)
    assert jnp.allclose(loss, loss_ref, atol=1e-4, rtol=1e-4)
    assert bool(jnp.all(mask == mask_ref))

    print("KERNEL_OK")
</pallas_src>

<mosaic_0001>
module attributes {stable_mosaic.version = 11 : i64} {
  func.func @fused_forward_kernel(%arg0: memref<16xi32, #tpu.memory_space<smem>>, %arg1: memref<2xi32, #tpu.memory_space<smem>>, %arg2: memref<128x128xf32, #tpu.memory_space<vmem>>, %arg3: memref<32x128xf32, #tpu.memory_space<vmem>>, %arg4: memref<128x128xf32, #tpu.memory_space<vmem>>, %arg5: memref<1x1xf32, #tpu.memory_space<smem>>, %arg6: memref<16x128xf32, #tpu.memory_space<vmem>>, %arg7: memref<16x128xf32, #tpu.memory_space<vmem>>, %arg8: memref<16x128xf32, #tpu.memory_space<vmem>>) attributes {dimension_semantics = [], scalar_prefetch = 0 : i64, scratch_operands = 2 : i64, tpu.core_type = #tpu.core_type<tc>} {
    %0 = tpu.iota {dimensions = array<i32: 1>} : vector<1x128xi32>
    %c0 = arith.constant 0 : index
    %1 = memref.load %arg0[%c0] : memref<16xi32, #tpu.memory_space<smem>>
    %2 = vector.broadcast %1 : i32 to vector<1x128xi32>
    %3 = arith.cmpi eq, %0, %2 : vector<1x128xi32>
    %4 = arith.extui %3 : vector<1x128xi1> to vector<1x128xi32>
    %5 = arith.sitofp %4 : vector<1x128xi32> to vector<1x128xf32>
    %c0_0 = arith.constant 0 : index
    %c0_1 = arith.constant 0 : index
    %6 = vector.load %arg7[%c0_0, %c0_1] : memref<16x128xf32, #tpu.memory_space<vmem>>, vector<1x128xf32>
    tpu.vector_store %arg7[%c0_0, %c0_1], %5 {strides = array<i32>} : memref<16x128xf32, #tpu.memory_space<vmem>>, vector<1x128xf32>,
    %c0_2 = arith.constant 0 : index
    %7 = memref.load %arg1[%c0_2] : memref<2xi32, #tpu.memory_space<smem>>
    %c0_i32 = arith.constant 0 : i32
    %8 = arith.cmpi sle, %7, %c0_i32 : i32
    %9 = arith.extui %8 : i1 to i32
    %10 = arith.sitofp %9 : i32 to f32
    %c1 = arith.constant 1 : index
    %11 = memref.load %arg0[%c1] : memref<16xi32, #tpu.memory_space<smem>>
    %12 = vector.broadcast %11 : i32 to vector<1x128xi32>
    %13 = arith.cmpi eq, %0, %12 : vector<1x128xi32>
    %cst = arith.constant 0.000000e+00 : f32
    %14 = vector.broadcast %10 : f32 to vector<1x128xf32>
    %15 = vector.broadcast %cst : f32 to vector<1x128xf32>
    %16 = arith.select %13, %14, %15 : vector<1x128xi1>, vector<1x128xf32>
    %c0_3 = arith.constant 0 : index
    %c0_4 = arith.constant 0 : index
    %17 = vector.load %arg8[%c0_3, %c0_4] : memref<16x128xf32, #tpu.memory_space<vmem>>, vector<1x128xf32>
    tpu.vector_store %arg8[%c0_3, %c0_4], %16 {strides = array<i32>} : memref<16x128xf32, #tpu.memory_space<vmem>>, vector<1x128xf32>,
    %c1_5 = arith.constant 1 : index
    %18 = memref.load %arg0[%c1_5] : memref<16xi32, #tpu.memory_space<smem>>
    %19 = vector.broadcast %18 : i32 to vector<1x128xi32>
    %20 = arith.cmpi eq, %0, %19 : vector<1x128xi32>
    %21 = arith.extui %20 : vector<1x128xi1> to vector<1x128xi32>
    %22 = arith.sitofp %21 : vector<1x128xi32> to vector<1x128xf32>
    %c1_6 = arith.constant 1 : index
    %c0_7 = arith.constant 0 : index
    %23 = vector.load %arg7[%c1_6, %c0_7] : memref<16x128xf32, #tpu.memory_space<vmem>>, vector<1x128xf32>
    tpu.vector_store %arg7[%c1_6, %c0_7], %22 {strides = array<i32>} : memref<16x128xf32, #tpu.memory_space<vmem>>, vector<1x128xf32>,
    %c0_8 = arith.constant 0 : index
    %24 = memref.load %arg1[%c0_8] : memref<2xi32, #tpu.memory_space<smem>>
    %c1_i32 = arith.constant 1 : i32
    %25 = arith.cmpi sle, %24, %c1_i32 : i32
    %26 = arith.extui %25 : i1 to i32
    %27 = arith.sitofp %26 : i32 to f32
    %c2 = arith.constant 2 : index
    %28 = memref.load %arg0[%c2] : memref<16xi32, #tpu.memory_space<smem>>
    %29 = vector.broadcast %28 : i32 to vector<1x128xi32>
    %30 = arith.cmpi eq, %0, %29 : vector<1x128xi32>
    %cst_9 = arith.constant 0.000000e+00 : f32
    %31 = vector.broadcast %27 : f32 to vector<1x128xf32>
    %32 = vector.broadcast %cst_9 : f32 to vector<1x128xf32>
    %33 = arith.select %30, %31, %32 : vector<1x128xi1>, vector<1x128xf32>
    %c1_10 = arith.constant 1 : index
    %c0_11 = arith.constant 0 : index
    %34 = vector.load %arg8[%c1_10, %c0_11] : memref<16x128xf32, #tpu.memory_space<vmem>>, vector<1x128xf32>
    tpu.vector_store %arg8[%c1_10, %c0_11], %33 {strides = array<i32>} : memref<16x128xf32, #tpu.memory_space<vmem>>, vector<1x128xf32>,
    %c2_12 = arith.constant 2 : index
    %35 = memref.load %arg0[%c2_12] : memref<16xi32, #tpu.memory_space<smem>>
    %36 = vector.broadcast %35 : i32 to vector<1x128xi32>
    %37 = arith.cmpi eq, %0, %36 : vector<1x128xi32>
    %38 = arith.extui %37 : vector<1x128xi1> to vector<1x128xi32>
    %39 = arith.sitofp %38 : vector<1x128xi32> to vector<1x128xf32>
    %c2_13 = arith.constant 2 : index
    %c0_14 = arith.constant 0 : index
    %40 = vector.load %arg7[%c2_13, %c0_14] : memref<16x128xf32, #tpu.memory_space<vmem>>, vector<1x128xf32>
    tpu.vector_store %arg7[%c2_13, %c0_14], %39 {strides = array<i32>} : memref<16x128xf32, #tpu.memory_space<vmem>>, vector<1x128xf32>,
    %c0_15 = arith.constant 0 : index
    %41 = memref.load %arg1[%c0_15] : memref<2xi32, #tpu.memory_space<smem>>
    %c2_i32 = arith.constant 2 : i32
    %42 = arith.cmpi sle, %41, %c2_i32 : i32
    %43 = arith.extui %42 : i1 to i32
    %44 = arith.sitofp %43 : i32 to f32
    %c3 = arith.constant 3 : index
    %45 = memref.load %arg0[%c3] : memref<16xi32, #tpu.memory_space<smem>>
    %46 = vector.broadcast %45 : i32 to vector<1x128xi32>
    %47 = arith.cmpi eq, %0, %46 : vector<1x128xi32>
    %cst_16 = arith.constant 0.000000e+00 : f32
    %48 = vector.broadcast %44 : f32 to vector<1x128xf32>
    %49 = vector.broadcast %cst_16 : f32 to vector<1x128xf32>
    %50 = arith.select %47, %48, %49 : vector<1x128xi1>, vector<1x128xf32>
    %c2_17 = arith.constant 2 : index
    %c0_18 = arith.constant 0 : index
    %51 = vector.load %arg8[%c2_17, %c0_18] : memref<16x128xf32, #tpu.memory_space<vmem>>, vector<1x128xf32>
    tpu.vector_store %arg8[%c2_17, %c0_18], %50 {strides = array<i32>} : memref<16x128xf32, #tpu.memory_space<vmem>>, vector<1x128xf32>,
    %c3_19 = arith.constant 3 : index
    %52 = memref.load %arg0[%c3_19] : memref<16xi32, #tpu.memory_space<smem>>
    %53 = vector.broadcast %52 : i32 to vector<1x128xi32>
    %54 = arith.cmpi eq, %0, %53 : vector<1x128xi32>
    %55 = arith.extui %54 : vector<1x128xi1> to vector<1x128xi32>
    %56 = arith.sitofp %55 : vector<1x128xi32> to vector<1x128xf32>
    %c3_20 = arith.constant 3 : index
    %c0_21 = arith.constant 0 : index
    %57 = vector.load %arg7[%c3_20, %c0_21] : memref<16x128xf32, #tpu.memory_space<vmem>>, vector<1x128xf32>
    tpu.vector_store %arg7[%c3_20, %c0_21], %56 {strides = array<i32>} : memref<16x128xf32, #tpu.memory_space<vmem>>, vector<1x128xf32>,
    %c0_22 = arith.constant 0 : index
    %58 = memref.load %arg1[%c0_22] : memref<2xi32, #tpu.memory_space<smem>>
    %c3_i32 = arith.constant 3 : i32
    %59 = arith.cmpi sle, %58, %c3_i32 : i32
    %60 = arith.extui %59 : i1 to i32
    %61 = arith.sitofp %60 : i32 to f32
    %c4 = arith.constant 4 : index
    %62 = memref.load %arg0[%c4] : memref<16xi32, #tpu.memory_space<smem>>
    %63 = vector.broadcast %62 : i32 to vector<1x128xi32>
    %64 = arith.cmpi eq, %0, %63 : vector<1x128xi32>
    %cst_23 = arith.constant 0.000000e+00 : f32
    %65 = vector.broadcast %61 : f32 to vector<1x128xf32>
    %66 = vector.broadcast %cst_23 : f32 to vector<1x128xf32>
    %67 = arith.select %64, %65, %66 : vector<1x128xi1>, vector<1x128xf32>
    %c3_24 = arith.constant 3 : index
    %c0_25 = arith.constant 0 : index
    %68 = vector.load %arg8[%c3_24, %c0_25] : memref<16x128xf32, #tpu.memory_space<vmem>>, vector<1x128xf32>
    tpu.vector_store %arg8[%c3_24, %c0_25], %67 {strides = array<i32>} : memref<16x128xf32, #tpu.memory_space<vmem>>, vector<1x128xf32>,
    %c4_26 = arith.constant 4 : index
    %69 = memref.load %arg0[%c4_26] : memref<16xi32, #tpu.memory_space<smem>>
    %70 = vector.broadcast %69 : i32 to vector<1x128xi32>
    %71 = arith.cmpi eq, %0, %70 : vector<1x128xi32>
    %72 = arith.extui %71 : vector<1x128xi1> to vector<1x128xi32>
    %73 = arith.sitofp %72 : vector<1x128xi32> to vector<1x128xf32>
    %c4_27 = arith.constant 4 : index
    %c0_28 = arith.constant 0 : index
    %74 = vector.load %arg7[%c4_27, %c0_28] : memref<16x128xf32, #tpu.memory_space<vmem>>, vector<1x128xf32>
    tpu.vector_store %arg7[%c4_27, %c0_28], %73 {strides = array<i32>} : memref<16x128xf32, #tpu.memory_space<vmem>>, vector<1x128xf32>,
    %c0_29 = arith.constant 0 : index
    %75 = memref.load %arg1[%c0_29] : memref<2xi32, #tpu.memory_space<smem>>
    %c4_i32 = arith.constant 4 : i32
    %76 = arith.cmpi sle, %75, %c4_i32 : i32
    %77 = arith.extui %76 : i1 to i32
    %78 = arith.sitofp %77 : i32 to f32
    %c5 = arith.constant 5 : index
    %79 = memref.load %arg0[%c5] : memref<16xi32, #tpu.memory_space<smem>>
    %80 = vector.broadcast %79 : i32 to vector<1x128xi32>
    %81 = arith.cmpi eq, %0, %80 : vector<1x128xi32>
    %cst_30 = arith.constant 0.000000e+00 : f32
    %82 = vector.broadcast %78 : f32 to vector<1x128xf32>
    %83 = vector.broadcast %cst_30 : f32 to vector<1x128xf32>
    %84 = arith.select %81, %82, %83 : vector<1x128xi1>, vector<1x128xf32>
    %c4_31 = arith.constant 4 : index
    %c0_32 = arith.constant 0 : index
    %85 = vector.load %arg8[%c4_31, %c0_32] : memref<16x128xf32, #tpu.memory_space<vmem>>, vector<1x128xf32>
    tpu.vector_store %arg8[%c4_31, %c0_32], %84 {strides = array<i32>} : memref<16x128xf32, #tpu.memory_space<vmem>>, vector<1x128xf32>,
    %c5_33 = arith.constant 5 : index
    %86 = memref.load %arg0[%c5_33] : memref<16xi32, #tpu.memory_space<smem>>
    %87 = vector.broadcast %86 : i32 to vector<1x128xi32>
    %88 = arith.cmpi eq, %0, %87 : vector<1x128xi32>
    %89 = arith.extui %88 : vector<1x128xi1> to vector<1x128xi32>
    %90 = arith.sitofp %89 : vector<1x128xi32> to vector<1x128xf32>
    %c5_34 = arith.constant 5 : index
    %c0_35 = arith.constant 0 : index
    %91 = vector.load %arg7[%c5_34, %c0_35] : memref<16x128xf32, #tpu.memory_space<vmem>>, vector<1x128xf32>
    tpu.vector_store %arg7[%c5_34, %c0_35], %90 {strides = array<i32>} : memref<16x128xf32, #tpu.memory_space<vmem>>, vector<1x128xf32>,
    %c0_36 = arith.constant 0 : index
    %92 = memref.load %arg1[%c0_36] : memref<2xi32, #tpu.memory_space<smem>>
    %c5_i32 = arith.constant 5 : i32
    %93 = arith.cmpi sle, %92, %c5_i32 : i32
    %94 = arith.extui %93 : i1 to i32
    %95 = arith.sitofp %94 : i32 to f32
    %c6 = arith.constant 6 : index
    %96 = memref.load %arg0[%c6] : memref<16xi32, #tpu.memory_space<smem>>
    %97 = vector.broadcast %96 : i32 to vector<1x128xi32>
    %98 = arith.cmpi eq, %0, %97 : vector<1x128xi32>
    %cst_37 = arith.constant 0.000000e+00 : f32
    %99 = vector.broadcast %95 : f32 to vector<1x128xf32>
    %100 = vector.broadcast %cst_37 : f32 to vector<1x128xf32>
    %101 = arith.select %98, %99, %100 : vector<1x128xi1>, vector<1x128xf32>
    %c5_38 = arith.constant 5 : index
    %c0_39 = arith.constant 0 : index
    %102 = vector.load %arg8[%c5_38, %c0_39] : memref<16x128xf32, #tpu.memory_space<vmem>>, vector<1x128xf32>
    tpu.vector_store %arg8[%c5_38, %c0_39], %101 {strides = array<i32>} : memref<16x128xf32, #tpu.memory_space<vmem>>, vector<1x128xf32>,
    %c6_40 = arith.constant 6 : index
    %103 = memref.load %arg0[%c6_40] : memref<16xi32, #tpu.memory_space<smem>>
    %104 = vector.broadcast %103 : i32 to vector<1x128xi32>
    %105 = arith.cmpi eq, %0, %104 : vector<1x128xi32>
    %106 = arith.extui %105 : vector<1x128xi1> to vector<1x128xi32>
    %107 = arith.sitofp %106 : vector<1x128xi32> to vector<1x128xf32>
    %c6_41 = arith.constant 6 : index
    %c0_42 = arith.constant 0 : index
    %108 = vector.load %arg7[%c6_41, %c0_42] : memref<16x128xf32, #tpu.memory_space<vmem>>, vector<1x128xf32>
    tpu.vector_store %arg7[%c6_41, %c0_42], %107 {strides = array<i32>} : memref<16x128xf32, #tpu.memory_space<vmem>>, vector<1x128xf32>,
    %c0_43 = arith.constant 0 : index
    %109 = memref.load %arg1[%c0_43] : memref<2xi32, #tpu.memory_space<smem>>
    %c6_i32 = arith.constant 6 : i32
    %110 = arith.cmpi sle, %109, %c6_i32 : i32
    %111 = arith.extui %110 : i1 to i32
    %112 = arith.sitofp %111 : i32 to f32
    %c7 = arith.constant 7 : index
    %113 = memref.load %arg0[%c7] : memref<16xi32, #tpu.memory_space<smem>>
    %114 = vector.broadcast %113 : i32 to vector<1x128xi32>
    %115 = arith.cmpi eq, %0, %114 : vector<1x128xi32>
    %cst_44 = arith.constant 0.000000e+00 : f32
    %116 = vector.broadcast %112 : f32 to vector<1x128xf32>
    %117 = vector.broadcast %cst_44 : f32 to vector<1x128xf32>
    %118 = arith.select %115, %116, %117 : vector<1x128xi1>, vector<1x128xf32>
    %c6_45 = arith.constant 6 : index
    %c0_46 = arith.constant 0 : index
    %119 = vector.load %arg8[%c6_45, %c0_46] : memref<16x128xf32, #tpu.memory_space<vmem>>, vector<1x128xf32>
    tpu.vector_store %arg8[%c6_45, %c0_46], %118 {strides = array<i32>} : memref<16x128xf32, #tpu.memory_space<vmem>>, vector<1x128xf32>,
    %c7_47 = arith.constant 7 : index
    %120 = memref.load %arg0[%c7_47] : memref<16xi32, #tpu.memory_space<smem>>
    %121 = vector.broadcast %120 : i32 to vector<1x128xi32>
    %122 = arith.cmpi eq, %0, %121 : vector<1x128xi32>
    %123 = arith.extui %122 : vector<1x128xi1> to vector<1x128xi32>
    %124 = arith.sitofp %123 : vector<1x128xi32> to vector<1x128xf32>
    %c7_48 = arith.constant 7 : index
    %c0_49 = arith.constant 0 : index
    %125 = vector.load %arg7[%c7_48, %c0_49] : memref<16x128xf32, #tpu.memory_space<vmem>>, vector<1x128xf32>
    tpu.vector_store %arg7[%c7_48, %c0_49], %124 {strides = array<i32>} : memref<16x128xf32, #tpu.memory_space<vmem>>, vector<1x128xf32>,
    %cst_50 = arith.constant 0.000000e+00 : f32
    %126 = vector.broadcast %cst_50 : f32 to vector<1x128xf32>
    %c7_51 = arith.constant 7 : index
    %c0_52 = arith.constant 0 : index
    %127 = vector.load %arg8[%c7_51, %c0_52] : memref<16x128xf32, #tpu.memory_space<vmem>>, vector<1x128xf32>
    tpu.vector_store %arg8[%c7_51, %c0_52], %126 {strides = array<i32>} : memref<16x128xf32, #tpu.memory_space<vmem>>, vector<1x128xf32>,
    %c8 = arith.constant 8 : index
    %128 = memref.load %arg0[%c8] : memref<16xi32, #tpu.memory_space<smem>>
    %129 = vector.broadcast %128 : i32 to vector<1x128xi32>
    %130 = arith.cmpi eq, %0, %129 : vector<1x128xi32>
    %131 = arith.extui %130 : vector<1x128xi1> to vector<1x128xi32>
    %132 = arith.sitofp %131 : vector<1x128xi32> to vector<1x128xf32>
    %c8_53 = arith.constant 8 : index
    %c0_54 = arith.constant 0 : index
    %133 = vector.load %arg7[%c8_53, %c0_54] : memref<16x128xf32, #tpu.memory_space<vmem>>, vector<1x128xf32>
    tpu.vector_store %arg7[%c8_53, %c0_54], %132 {strides = array<i32>} : memref<16x128xf32, #tpu.memory_space<vmem>>, vector<1x128xf32>,
    %c1_55 = arith.constant 1 : index
    %134 = memref.load %arg1[%c1_55] : memref<2xi32, #tpu.memory_space<smem>>
    %c0_i32_56 = arith.constant 0 : i32
    %135 = arith.cmpi sle, %134, %c0_i32_56 : i32
    %136 = arith.extui %135 : i1 to i32
    %137 = arith.sitofp %136 : i32 to f32
    %c9 = arith.constant 9 : index
    %138 = memref.load %arg0[%c9] : memref<16xi32, #tpu.memory_space<smem>>
    %139 = vector.broadcast %138 : i32 to vector<1x128xi32>
    %140 = arith.cmpi eq, %0, %139 : vector<1x128xi32>
    %cst_57 = arith.constant 0.000000e+00 : f32
    %141 = vector.broadcast %137 : f32 to vector<1x128xf32>
    %142 = vector.broadcast %cst_57 : f32 to vector<1x128xf32>
    %143 = arith.select %140, %141, %142 : vector<1x128xi1>, vector<1x128xf32>
    %c8_58 = arith.constant 8 : index
    %c0_59 = arith.constant 0 : index
    %144 = vector.load %arg8[%c8_58, %c0_59] : memref<16x128xf32, #tpu.memory_space<vmem>>, vector<1x128xf32>
    tpu.vector_store %arg8[%c8_58, %c0_59], %143 {strides = array<i32>} : memref<16x128xf32, #tpu.memory_space<vmem>>, vector<1x128xf32>,
    %c9_60 = arith.constant 9 : index
    %145 = memref.load %arg0[%c9_60] : memref<16xi32, #tpu.memory_space<smem>>
    %146 = vector.broadcast %145 : i32 to vector<1x128xi32>
    %147 = arith.cmpi eq, %0, %146 : vector<1x128xi32>
    %148 = arith.extui %147 : vector<1x128xi1> to vector<1x128xi32>
    %149 = arith.sitofp %148 : vector<1x128xi32> to vector<1x128xf32>
    %c9_61 = arith.constant 9 : index
    %c0_62 = arith.constant 0 : index
    %150 = vector.load %arg7[%c9_61, %c0_62] : memref<16x128xf32, #tpu.memory_space<vmem>>, vector<1x128xf32>
    tpu.vector_store %arg7[%c9_61, %c0_62], %149 {strides = array<i32>} : memref<16x128xf32, #tpu.memory_space<vmem>>, vector<1x128xf32>,
    %c1_63 = arith.constant 1 : index
    %151 = memref.load %arg1[%c1_63] : memref<2xi32, #tpu.memory_space<smem>>
    %c1_i32_64 = arith.constant 1 : i32
    %152 = arith.cmpi sle, %151, %c1_i32_64 : i32
    %153 = arith.extui %152 : i1 to i32
    %154 = arith.sitofp %153 : i32 to f32
    %c10 = arith.constant 10 : index
    %155 = memref.load %arg0[%c10] : memref<16xi32, #tpu.memory_space<smem>>
    %156 = vector.broadcast %155 : i32 to vector<1x128xi32>
    %157 = arith.cmpi eq, %0, %156 : vector<1x128xi32>
    %cst_65 = arith.constant 0.000000e+00 : f32
    %158 = vector.broadcast %154 : f32 to vector<1x128xf32>
    %159 = vector.broadcast %cst_65 : f32 to vector<1x128xf32>
    %160 = arith.select %157, %158, %159 : vector<1x128xi1>, vector<1x128xf32>
    %c9_66 = arith.constant 9 : index
    %c0_67 = arith.constant 0 : index
    %161 = vector.load %arg8[%c9_66, %c0_67] : memref<16x128xf32, #tpu.memory_space<vmem>>, vector<1x128xf32>
    tpu.vector_store %arg8[%c9_66, %c0_67], %160 {strides = array<i32>} : memref<16x128xf32, #tpu.memory_space<vmem>>, vector<1x128xf32>,
    %c10_68 = arith.constant 10 : index
    %162 = memref.load %arg0[%c10_68] : memref<16xi32, #tpu.memory_space<smem>>
    %163 = vector.broadcast %162 : i32 to vector<1x128xi32>
    %164 = arith.cmpi eq, %0, %163 : vector<1x128xi32>
    %165 = arith.extui %164 : vector<1x128xi1> to vector<1x128xi32>
    %166 = arith.sitofp %165 : vector<1x128xi32> to vector<1x128xf32>
    %c10_69 = arith.constant 10 : index
    %c0_70 = arith.constant 0 : index
    %167 = vector.load %arg7[%c10_69, %c0_70] : memref<16x128xf32, #tpu.memory_space<vmem>>, vector<1x128xf32>
    tpu.vector_store %arg7[%c10_69, %c0_70], %166 {strides = array<i32>} : memref<16x128xf32, #tpu.memory_space<vmem>>, vector<1x128xf32>,
    %c1_71 = arith.constant 1 : index
    %168 = memref.load %arg1[%c1_71] : memref<2xi32, #tpu.memory_space<smem>>
    %c2_i32_72 = arith.constant 2 : i32
    %169 = arith.cmpi sle, %168, %c2_i32_72 : i32
    %170 = arith.extui %169 : i1 to i32
    %171 = arith.sitofp %170 : i32 to f32
    %c11 = arith.constant 11 : index
    %172 = memref.load %arg0[%c11] : memref<16xi32, #tpu.memory_space<smem>>
    %173 = vector.broadcast %172 : i32 to vector<1x128xi32>
    %174 = arith.cmpi eq, %0, %173 : vector<1x128xi32>
    %cst_73 = arith.constant 0.000000e+00 : f32
    %175 = vector.broadcast %171 : f32 to vector<1x128xf32>
    %176 = vector.broadcast %cst_73 : f32 to vector<1x128xf32>
    %177 = arith.select %174, %175, %176 : vector<1x128xi1>, vector<1x128xf32>
    %c10_74 = arith.constant 10 : index
    %c0_75 = arith.constant 0 : index
    %178 = vector.load %arg8[%c10_74, %c0_75] : memref<16x128xf32, #tpu.memory_space<vmem>>, vector<1x128xf32>
    tpu.vector_store %arg8[%c10_74, %c0_75], %177 {strides = array<i32>} : memref<16x128xf32, #tpu.memory_space<vmem>>, vector<1x128xf32>,
    %c11_76 = arith.constant 11 : index
    %179 = memref.load %arg0[%c11_76] : memref<16xi32, #tpu.memory_space<smem>>
    %180 = vector.broadcast %179 : i32 to vector<1x128xi32>
    %181 = arith.cmpi eq, %0, %180 : vector<1x128xi32>
    %182 = arith.extui %181 : vector<1x128xi1> to vector<1x128xi32>
    %183 = arith.sitofp %182 : vector<1x128xi32> to vector<1x128xf32>
    %c11_77 = arith.constant 11 : index
    %c0_78 = arith.constant 0 : index
    %184 = vector.load %arg7[%c11_77, %c0_78] : memref<16x128xf32, #tpu.memory_space<vmem>>, vector<1x128xf32>
    tpu.vector_store %arg7[%c11_77, %c0_78], %183 {strides = array<i32>} : memref<16x128xf32, #tpu.memory_space<vmem>>, vector<1x128xf32>,
    %c1_79 = arith.constant 1 : index
    %185 = memref.load %arg1[%c1_79] : memref<2xi32, #tpu.memory_space<smem>>
    %c3_i32_80 = arith.constant 3 : i32
    %186 = arith.cmpi sle, %185, %c3_i32_80 : i32
    %187 = arith.extui %186 : i1 to i32
    %188 = arith.sitofp %187 : i32 to f32
    %c12 = arith.constant 12 : index
    %189 = memref.load %arg0[%c12] : memref<16xi32, #tpu.memory_space<smem>>
    %190 = vector.broadcast %189 : i32 to vector<1x128xi32>
    %191 = arith.cmpi eq, %0, %190 : vector<1x128xi32>
    %cst_81 = arith.constant 0.000000e+00 : f32
    %192 = vector.broadcast %188 : f32 to vector<1x128xf32>
    %193 = vector.broadcast %cst_81 : f32 to vector<1x128xf32>
    %194 = arith.select %191, %192, %193 : vector<1x128xi1>, vector<1x128xf32>
    %c11_82 = arith.constant 11 : index
    %c0_83 = arith.constant 0 : index
    %195 = vector.load %arg8[%c11_82, %c0_83] : memref<16x128xf32, #tpu.memory_space<vmem>>, vector<1x128xf32>
    tpu.vector_store %arg8[%c11_82, %c0_83], %194 {strides = array<i32>} : memref<16x128xf32, #tpu.memory_space<vmem>>, vector<1x128xf32>,
    %c12_84 = arith.constant 12 : index
    %196 = memref.load %arg0[%c12_84] : memref<16xi32, #tpu.memory_space<smem>>
    %197 = vector.broadcast %196 : i32 to vector<1x128xi32>
    %198 = arith.cmpi eq, %0, %197 : vector<1x128xi32>
    %199 = arith.extui %198 : vector<1x128xi1> to vector<1x128xi32>
    %200 = arith.sitofp %199 : vector<1x128xi32> to vector<1x128xf32>
    %c12_85 = arith.constant 12 : index
    %c0_86 = arith.constant 0 : index
    %201 = vector.load %arg7[%c12_85, %c0_86] : memref<16x128xf32, #tpu.memory_space<vmem>>, vector<1x128xf32>
    tpu.vector_store %arg7[%c12_85, %c0_86], %200 {strides = array<i32>} : memref<16x128xf32, #tpu.memory_space<vmem>>, vector<1x128xf32>,
    %c1_87 = arith.constant 1 : index
    %202 = memref.load %arg1[%c1_87] : memref<2xi32, #tpu.memory_space<smem>>
    %c4_i32_88 = arith.constant 4 : i32
    %203 = arith.cmpi sle, %202, %c4_i32_88 : i32
    %204 = arith.extui %203 : i1 to i32
    %205 = arith.sitofp %204 : i32 to f32
    %c13 = arith.constant 13 : index
    %206 = memref.load %arg0[%c13] : memref<16xi32, #tpu.memory_space<smem>>
    %207 = vector.broadcast %206 : i32 to vector<1x128xi32>
    %208 = arith.cmpi eq, %0, %207 : vector<1x128xi32>
    %cst_89 = arith.constant 0.000000e+00 : f32
    %209 = vector.broadcast %205 : f32 to vector<1x128xf32>
    %210 = vector.broadcast %cst_89 : f32 to vector<1x128xf32>
    %211 = arith.select %208, %209, %210 : vector<1x128xi1>, vector<1x128xf32>
    %c12_90 = arith.constant 12 : index
    %c0_91 = arith.constant 0 : index
    %212 = vector.load %arg8[%c12_90, %c0_91] : memref<16x128xf32, #tpu.memory_space<vmem>>, vector<1x128xf32>
    tpu.vector_store %arg8[%c12_90, %c0_91], %211 {strides = array<i32>} : memref<16x128xf32, #tpu.memory_space<vmem>>, vector<1x128xf32>,
    %c13_92 = arith.constant 13 : index
    %213 = memref.load %arg0[%c13_92] : memref<16xi32, #tpu.memory_space<smem>>
    %214 = vector.broadcast %213 : i32 to vector<1x128xi32>
    %215 = arith.cmpi eq, %0, %214 : vector<1x128xi32>
    %216 = arith.extui %215 : vector<1x128xi1> to vector<1x128xi32>
    %217 = arith.sitofp %216 : vector<1x128xi32> to vector<1x128xf32>
    %c13_93 = arith.constant 13 : index
    %c0_94 = arith.constant 0 : index
    %218 = vector.load %arg7[%c13_93, %c0_94] : memref<16x128xf32, #tpu.memory_space<vmem>>, vector<1x128xf32>
    tpu.vector_store %arg7[%c13_93, %c0_94], %217 {strides = array<i32>} : memref<16x128xf32, #tpu.memory_space<vmem>>, vector<1x128xf32>,
    %c1_95 = arith.constant 1 : index
    %219 = memref.load %arg1[%c1_95] : memref<2xi32, #tpu.memory_space<smem>>
    %c5_i32_96 = arith.constant 5 : i32
    %220 = arith.cmpi sle, %219, %c5_i32_96 : i32
    %221 = arith.extui %220 : i1 to i32
    %222 = arith.sitofp %221 : i32 to f32
    %c14 = arith.constant 14 : index
    %223 = memref.load %arg0[%c14] : memref<16xi32, #tpu.memory_space<smem>>
    %224 = vector.broadcast %223 : i32 to vector<1x128xi32>
    %225 = arith.cmpi eq, %0, %224 : vector<1x128xi32>
    %cst_97 = arith.constant 0.000000e+00 : f32
    %226 = vector.broadcast %222 : f32 to vector<1x128xf32>
    %227 = vector.broadcast %cst_97 : f32 to vector<1x128xf32>
    %228 = arith.select %225, %226, %227 : vector<1x128xi1>, vector<1x128xf32>
    %c13_98 = arith.constant 13 : index
    %c0_99 = arith.constant 0 : index
    %229 = vector.load %arg8[%c13_98, %c0_99] : memref<16x128xf32, #tpu.memory_space<vmem>>, vector<1x128xf32>
    tpu.vector_store %arg8[%c13_98, %c0_99], %228 {strides = array<i32>} : memref<16x128xf32, #tpu.memory_space<vmem>>, vector<1x128xf32>,
    %c14_100 = arith.constant 14 : index
    %230 = memref.load %arg0[%c14_100] : memref<16xi32, #tpu.memory_space<smem>>
    %231 = vector.broadcast %230 : i32 to vector<1x128xi32>
    %232 = arith.cmpi eq, %0, %231 : vector<1x128xi32>
    %233 = arith.extui %232 : vector<1x128xi1> to vector<1x128xi32>
    %234 = arith.sitofp %233 : vector<1x128xi32> to vector<1x128xf32>
    %c14_101 = arith.constant 14 : index
    %c0_102 = arith.constant 0 : index
    %235 = vector.load %arg7[%c14_101, %c0_102] : memref<16x128xf32, #tpu.memory_space<vmem>>, vector<1x128xf32>
    tpu.vector_store %arg7[%c14_101, %c0_102], %234 {strides = array<i32>} : memref<16x128xf32, #tpu.memory_space<vmem>>, vector<1x128xf32>,
    %c1_103 = arith.constant 1 : index
    %236 = memref.load %arg1[%c1_103] : memref<2xi32, #tpu.memory_space<smem>>
    %c6_i32_104 = arith.constant 6 : i32
    %237 = arith.cmpi sle, %236, %c6_i32_104 : i32
    %238 = arith.extui %237 : i1 to i32
    %239 = arith.sitofp %238 : i32 to f32
    %c15 = arith.constant 15 : index
    %240 = memref.load %arg0[%c15] : memref<16xi32, #tpu.memory_space<smem>>
    %241 = vector.broadcast %240 : i32 to vector<1x128xi32>
    %242 = arith.cmpi eq, %0, %241 : vector<1x128xi32>
    %cst_105 = arith.constant 0.000000e+00 : f32
    %243 = vector.broadcast %239 : f32 to vector<1x128xf32>
    %244 = vector.broadcast %cst_105 : f32 to vector<1x128xf32>
    %245 = arith.select %242, %243, %244 : vector<1x128xi1>, vector<1x128xf32>
    %c14_106 = arith.constant 14 : index
    %c0_107 = arith.constant 0 : index
    %246 = vector.load %arg8[%c14_106, %c0_107] : memref<16x128xf32, #tpu.memory_space<vmem>>, vector<1x128xf32>
    tpu.vector_store %arg8[%c14_106, %c0_107], %245 {strides = array<i32>} : memref<16x128xf32, #tpu.memory_space<vmem>>, vector<1x128xf32>,
    %c15_108 = arith.constant 15 : index
    %247 = memref.load %arg0[%c15_108] : memref<16xi32, #tpu.memory_space<smem>>
    %248 = vector.broadcast %247 : i32 to vector<1x128xi32>
    %249 = arith.cmpi eq, %0, %248 : vector<1x128xi32>
    %250 = arith.extui %249 : vector<1x128xi1> to vector<1x128xi32>
    %251 = arith.sitofp %250 : vector<1x128xi32> to vector<1x128xf32>
    %c15_109 = arith.constant 15 : index
    %c0_110 = arith.constant 0 : index
    %252 = vector.load %arg7[%c15_109, %c0_110] : memref<16x128xf32, #tpu.memory_space<vmem>>, vector<1x128xf32>
    tpu.vector_store %arg7[%c15_109, %c0_110], %251 {strides = array<i32>} : memref<16x128xf32, #tpu.memory_space<vmem>>, vector<1x128xf32>,
    %cst_111 = arith.constant 0.000000e+00 : f32
    %253 = vector.broadcast %cst_111 : f32 to vector<1x128xf32>
    %c15_112 = arith.constant 15 : index
    %c0_113 = arith.constant 0 : index
    %254 = vector.load %arg8[%c15_112, %c0_113] : memref<16x128xf32, #tpu.memory_space<vmem>>, vector<1x128xf32>
    tpu.vector_store %arg8[%c15_112, %c0_113], %253 {strides = array<i32>} : memref<16x128xf32, #tpu.memory_space<vmem>>, vector<1x128xf32>,
    %c0_114 = arith.constant 0 : index
    %c0_115 = arith.constant 0 : index
    %255 = vector.load %arg7[%c0_114, %c0_115] : memref<16x128xf32, #tpu.memory_space<vmem>>, vector<16x128xf32>
    %c0_116 = arith.constant 0 : index
    %c0_117 = arith.constant 0 : index
    %256 = vector.load %arg2[%c0_116, %c0_117] : memref<128x128xf32, #tpu.memory_space<vmem>>, vector<128x128xf32>
    %cst_118 = arith.constant dense<0.000000e+00> : vector<16x128xf32>
    %257 = tpu.matmul %255, %256, %cst_118 {dimension_numbers = #tpu.dot_dimension_numbers<[1], [0], [0], [1], [0, 0, 1, 1], [], []>, precision = #tpu.contract_precision<fp32>} : vector<16x128xf32>, vector<128x128xf32>, vector<16x128xf32> -> vector<16x128xf32>
    %c0_119 = arith.constant 0 : index
    %c0_120 = arith.constant 0 : index
    %258 = vector.load %arg3[%c0_119, %c0_120] : memref<32x128xf32, #tpu.memory_space<vmem>>, vector<8x128xf32>
    %259 = tpu.concatenate %258, %258 in 0 : vector<8x128xf32>, vector<8x128xf32> -> vector<16x128xf32>
    %260 = arith.addf %257, %259 : vector<16x128xf32>
    %c0_121 = arith.constant 0 : index
    %c0_122 = arith.constant 0 : index
    %261 = vector.load %arg4[%c0_121, %c0_122] : memref<128x128xf32, #tpu.memory_space<vmem>>, vector<128x128xf32>
    %cst_123 = arith.constant dense<0.000000e+00> : vector<16x128xf32>
    %262 = tpu.matmul %260, %261, %cst_123 {dimension_numbers = #tpu.dot_dimension_numbers<[1], [0], [0], [1], [0, 0, 1, 1], [], []>, precision = #tpu.contract_precision<fp32>} : vector<16x128xf32>, vector<128x128xf32>, vector<16x128xf32> -> vector<16x128xf32>
    %c0_124 = arith.constant 0 : index
    %c0_125 = arith.constant 0 : index
    %263 = vector.load %arg6[%c0_124, %c0_125] : memref<16x128xf32, #tpu.memory_space<vmem>>, vector<16x128xf32>
    tpu.vector_store %arg6[%c0_124, %c0_125], %262 {strides = array<i32>} : memref<16x128xf32, #tpu.memory_space<vmem>>, vector<16x128xf32>,
    %c13_i32 = arith.constant 13 : i32
    %264 = vector.broadcast %c13_i32 : i32 to vector<1x128xi32>
    %265 = arith.cmpi slt, %0, %264 : vector<1x128xi32>
    %cst_126 = arith.constant -1.000000e+30 : f32
    %266 = vector.shape_cast %265 : vector<1x128xi1> to vector<1x128xi1>
    %267 = vector.broadcast %266 : vector<1x128xi1> to vector<16x128xi1>
    %268 = vector.broadcast %cst_126 : f32 to vector<16x128xf32>
    %269 = arith.select %267, %262, %268 : vector<16x128xi1>, vector<16x128xf32>
    %cst_127 = arith.constant dense<0xFF800000> : vector<16xf32>
    %270 = vector.multi_reduction <maximumf>, %269, %cst_127 [1] : vector<16x128xf32> to vector<16xf32>
    %271 = vector.shape_cast %270 : vector<16xf32> to vector<16x1xf32>
    %272 = vector.broadcast %271 : vector<16x1xf32> to vector<16x128xf32>
    %273 = arith.subf %269, %272 : vector<16x128xf32>
    %274 = math.exp %273 : vector<16x128xf32>
    %cst_128 = arith.constant dense<0.000000e+00> : vector<16xf32>
    %275 = vector.multi_reduction <add>, %274, %cst_128 [1] : vector<16x128xf32> to vector<16xf32>
    %276 = vector.shape_cast %275 : vector<16xf32> to vector<16x1xf32>
    %277 = math.log %276 : vector<16x1xf32>
    %278 = arith.addf %271, %277 : vector<16x1xf32>
    %c0_129 = arith.constant 0 : index
    %c0_130 = arith.constant 0 : index
    %279 = vector.load %arg8[%c0_129, %c0_130] : memref<16x128xf32, #tpu.memory_space<vmem>>, vector<16x128xf32>
    %cst_131 = arith.constant dense<0.000000e+00> : vector<16xf32>
    %280 = vector.multi_reduction <add>, %279, %cst_131 [1] : vector<16x128xf32> to vector<16xf32>
    %281 = vector.shape_cast %280 : vector<16xf32> to vector<16x1xf32>
    %282 = arith.mulf %278, %281 : vector<16x1xf32>
    %283 = vector.shape_cast %282 : vector<16x1xf32> to vector<1x16x1xf32>
    %cst_132 = arith.constant dense<0.000000e+00> : vector<1xf32>
    %284 = vector.multi_reduction <add>, %283, %cst_132 [1, 2] : vector<1x16x1xf32> to vector<1xf32>
    %285 = vector.shape_cast %284 : vector<1xf32> to vector<1x1x1xf32>
    %286 = vector.extract %285[0, 0, 0] : f32 from vector<1x1x1xf32>
    %287 = arith.mulf %262, %279 : vector<16x128xf32>
    %288 = vector.shape_cast %287 : vector<16x128xf32> to vector<1x16x128xf32>
    %cst_133 = arith.constant dense<0.000000e+00> : vector<1xf32>
    %289 = vector.multi_reduction <add>, %288, %cst_133 [1, 2] : vector<1x16x128xf32> to vector<1xf32>
    %290 = vector.shape_cast %289 : vector<1xf32> to vector<1x1x1xf32>
    %291 = vector.extract %290[0, 0, 0] : f32 from vector<1x1x1xf32>
    %292 = arith.subf %286, %291 : f32
    %293 = vector.shape_cast %281 : vector<16x1xf32> to vector<1x16x1xf32>
    %cst_134 = arith.constant dense<0.000000e+00> : vector<1xf32>
    %294 = vector.multi_reduction <add>, %293, %cst_134 [1, 2] : vector<1x16x1xf32> to vector<1xf32>
    %295 = vector.shape_cast %294 : vector<1xf32> to vector<1x1x1xf32>
    %296 = vector.extract %295[0, 0, 0] : f32 from vector<1x1x1xf32>
    %cst_135 = arith.constant 1.000000e+00 : f32
    %297 = arith.maximumf %296, %cst_135 : f32
    %298 = arith.divf %292, %297 : f32
    %c0_136 = arith.constant 0 : index
    %c0_137 = arith.constant 0 : index
    %299 = memref.load %arg5[%c0_136, %c0_137] : memref<1x1xf32, #tpu.memory_space<smem>>
    memref.store %298, %arg5[%c0_136, %c0_137] : memref<1x1xf32, #tpu.memory_space<smem>>
    return
  }
}

</mosaic_0001>

<bundles_post_ra>
// kernel: tpu_custom_call.1
= control target key start
LH: loop header
LB: loop body
LE: loop exit
PB: predicated region body
PF: predicated region fallthrough
CT: control target
= control target key end

     0   :  { %12 = vsyncpa [#allocation7], 0  ;;  %s4044_s0 = inlined_call_operand.hbm [shape: s32[16], index: 0, kind: input, shape index: {}]   ;;  %s4045_s1 = inlined_call_operand.vmem [shape: s32[2], index: 1, kind: input, shape index: {}]   ;;  %s4046_s2 = inlined_call_operand.hbm [shape: f32[128,128], index: 2, kind: input, shape index: {}]   ;;  %s4047_s3 = inlined_call_operand.hbm [shape: f32[32,128], index: 3, kind: input, shape index: {}]   ;;  %s4048_s4 = inlined_call_operand.hbm [shape: f32[128,128], index: 4, kind: input, shape index: {}]   ;;  %s4049_s5 = inlined_call_operand.hbm [shape: f32[1,1], index: 5, kind: output, shape index: {0}]   ;;  %s4050_s6 = inlined_call_operand.hbm [shape: f32[16,128], index: 6, kind: output, shape index: {1}]  }
   0x1   :  { %13 = vsyncpa [#allocation9], 0 }
   0x2   :  { %14 = vsyncpa [#allocation5], 0 }
   0x3   :  { %15 = vsyncpa [#allocation13], 0 }
   0x4   :  { %16 = vsyncpa [#allocation8], 0 }
   0x5   :  { %17 = vsyncpa [#allocation6], 0  ;;  %s3099_s21 = smov [#allocation12]   ;;  %s32_s25 = sshll.u32 %s4045_s1, 4  ;;  %s3148_s25 = int_to_ptr.vmem [resolvable:$true] %s32_s25 }
   0x6   :  { %s53_s22 = sshll.u32 %s3099_s21, 4  ;;  %s2967_s28 = scalar_lea.hbm %s4047_s3, 512  ;;  %s54_s22 = int_to_ptr.vmem [resolvable:$true] %s53_s22 }
   0x7   :  { %p2968_p0 = scmp.ne.s32.totalorder %s4047_s3, %s2967_s28  ;;  %p2971_p1 = scmp.lt.u32.totalorder %s2967_s28, %s4047_s3 }
   0x9   :  { %p2973_p2 = pnand %p2971_p1, %p2968_p0 }
   0xb   :  { %2976 = shalt.err (!%p2973_p2)
}
   0xc   :  { %s2977_s9 = scalar_lea.vmem %s54_s22, 512  ;;  %p2982_p4 = scmp.lt.s32.totalorder %s54_s22, %s54_s22 }
   0xd   :  { %p2978_p3 = scmp.ne.s32.totalorder %s54_s22, %s2977_s9  ;;  %p2983_p5 = scmp.lt.s32.totalorder %s2977_s9, %s2977_s9 }
   0xf   :  { %p2984_p6 = por %p2983_p5, %p2982_p4 }
  0x11   :  { %p2985_p7 = pnand %p2984_p6, %p2978_p3 }
  0x13   :  { %2988 = shalt.err (!%p2985_p7)
}
  0x14   :  { %s3100_s1 = smov 128   ;;  %s3101_s10 = smov 8  }
  0x15   :  { %59 = dma.hbm_to_vmem [thread:$0]  %s4047_s3, 512, %s54_s22, [#allocation13], %s3100_s1, %s3100_s1, %s3101_s10  }
  0x16   :  { %s2989_s15 = scalar_lea.hbm %s4044_s0, 16 }
  0x17   :  { %p2990_p8 = scmp.ne.s32.totalorder %s4044_s0, %s2989_s15  ;;  %p2993_p9 = scmp.lt.u32.totalorder %s2989_s15, %s4044_s0 }
  0x19   :  { %p2995_p10 = pnand %p2993_p9, %p2990_p8 }
  0x1b   :  { %2998 = shalt.err (!%p2995_p10)
}
  0x1c   :  { %s3102_s20 = smov [#allocation4]   ;;  %s2999_s3 = scalar_lea.vmem %s3148_s25, 16 }
  0x1d   :  { %25 = dma.hbm_to_smem %s4044_s0, 16, %s3102_s20, [#allocation7]  }
  0x1e   :  { %p3000_p11 = scmp.ne.s32.totalorder %s3148_s25, %s2999_s3  ;;  %p3004_p12 = scmp.lt.s32.totalorder %s3148_s25, %s3148_s25 }
  0x1f   :  { %p3005_p13 = scmp.lt.s32.totalorder %s2999_s3, %s2999_s3 }
  0x21   :  { %p3006_p0 = por %p3005_p13, %p3004_p12 }
  0x23   :  { %p3007_p1 = pnand %p3006_p0, %p3000_p11 }
  0x25   :  { %3010 = shalt.err (!%p3007_p1)
}
  0x26   :  { %s3103_s22 = smov [#allocation10]   ;;  %s3104_s24 = smov [#allocation11]  }
  0x27   :  { %35 = dma.vmem_to_smem %s3148_s25, 16, %s3103_s22, [#allocation9]  }
  0x28   :  { %s41_s26 = sshll.u32 %s3104_s24, 4  ;;  %s3105_s27 = smov [#allocation14]   ;;  %s42_s26 = int_to_ptr.vmem [resolvable:$true] %s41_s26 }
  0x29   :  { %s65_s28 = sshll.u32 %s3105_s27, 4  ;;  %s3011_s0 = scalar_lea.hbm %s4046_s2, 2048  ;;  %s66_s28 = int_to_ptr.vmem [resolvable:$true] %s65_s28 }
  0x2a   :  { %p3012_p2 = scmp.ne.s32.totalorder %s4046_s2, %s3011_s0  ;;  %p3015_p3 = scmp.lt.u32.totalorder %s3011_s0, %s4046_s2 }
  0x2c   :  { %p3017_p4 = pnand %p3015_p3, %p3012_p2 }
  0x2e   :  { %3020 = shalt.err (!%p3017_p4)
}
  0x2f   :  { %s3021_s25 = scalar_lea.vmem %s42_s26, 2048  ;;  %p3026_p6 = scmp.lt.s32.totalorder %s42_s26, %s42_s26 }
  0x30   :  { %p3022_p5 = scmp.ne.s32.totalorder %s42_s26, %s3021_s25  ;;  %p3027_p7 = scmp.lt.s32.totalorder %s3021_s25, %s3021_s25 }
  0x32   :  { %p3028_p8 = por %p3027_p7, %p3026_p6 }
  0x34   :  { %p3029_p9 = pnand %p3028_p8, %p3022_p5 }
  0x36   :  { %3032 = shalt.err (!%p3029_p9)
}
  0x37   :  { %47 = dma.hbm_to_vmem [thread:$0]  %s4046_s2, 2048, %s42_s26, [#allocation5], %s3100_s1, %s3100_s1, %s3101_s10  }
  0x38   :  { %s3033_s16 = scalar_lea.hbm %s4048_s4, 2048 }
  0x39   :  { %p3034_p10 = scmp.ne.s32.totalorder %s4048_s4, %s3033_s16  ;;  %p3037_p11 = scmp.lt.u32.totalorder %s3033_s16, %s4048_s4 }
  0x3b   :  { %p3039_p12 = pnand %p3037_p11, %p3034_p10 }
  0x3d   :  { %3042 = shalt.err (!%p3039_p12)
}
  0x3e   :  { %s3043_s21 = scalar_lea.vmem %s66_s28, 2048  ;;  %p3048_p0 = scmp.lt.s32.totalorder %s66_s28, %s66_s28 }
  0x3f   :  { %p3044_p13 = scmp.ne.s32.totalorder %s66_s28, %s3043_s21  ;;  %p3049_p1 = scmp.lt.s32.totalorder %s3043_s21, %s3043_s21 }
  0x41   :  { %p3050_p2 = por %p3049_p1, %p3048_p0 }
  0x43   :  { %p3051_p3 = pnand %p3050_p2, %p3044_p13 }
  0x45   :  { %3054 = shalt.err (!%p3051_p3)
}
  0x46   :  { %71 = dma.hbm_to_vmem [thread:$0]  %s4048_s4, 2048, %s66_s28, [#allocation13], %s3100_s1, %s3100_s1, %s3101_s10  }
  0x47   :  { %3087 = dma.done.wait [#allocation7], 16  }
  0x48   :  { %3088 = vsyncadd [#allocation7], 4294967280 }
  0x49   :  { %3089 = dma.done.wait [#allocation9], 16  }
  0x4a   :  { %3090 = vsyncadd [#allocation9], 4294967280 }
  0x4b   :  { %3091 = dma.done.wait [#allocation5], 2048  }
  0x4c   :  { %3092 = vsyncadd [#allocation5], 4294965248 }
  0x4d   :  { %3093 = dma.done.wait [#allocation13], 2560  }
  0x4e   :  { %3094 = vsyncadd [#allocation13], 4294964736 }
  0x4f   :  { %87 = sfence }
  0x50   :  { %v330_v0 = vld [vmem:[#allocation11] sm:$0xff]  ;;  %v3212_v1 = vld [vmem:[#allocation11 + $0x8] sm:$0xff]  ;;  %v3214_v2 = vld [vmem:[#allocation11 + $0x10] sm:$0xff]  ;;  %s3216_s3 = sld [smem:[#allocation4]]  ;;  %v3106_v9 = vmov 0.0   ;;  %v88_v14 = vlaneseq  ;;  %s3261_s4 = sld [smem:[#allocation4 + $0x1]] }
  0x51   :  { %v348_v3 = vand.u32 4294901760, %v330_v0  ;;  %v351_v4 = vand.u32 4294901760, %v3212_v1  ;;  %v3219_v5 = vld [vmem:[#allocation11 + $0x18] sm:$0xff]  ;;  %v354_v6 = vand.u32 4294901760, %v3214_v2  ;;  %v3222_v7 = vld [vmem:[#allocation11 + $0x20] sm:$0xff]  ;;  %v3224_v8 = vld [vmem:[#allocation11 + $0x28] sm:$0xff] }
  0x52   :  { %208 = vst [vmem:[#allocation3 + $0x7] sm:$0x1] %v3106_v9  ;;  %327 = vst [vmem:[#allocation3 + $0xf] sm:$0x1] %v3106_v9  ;;  %v357_v10 = vand.u32 4294901760, %v3219_v5  ;;  %v3229_v11 = vld [vmem:[#allocation11 + $0x30] sm:$0xff] }
  0x53   :  { %v3231_v12 = vld [vmem:[#allocation11 + $0x38] sm:$0xff]  ;;  %v3233_v13 = vld [vmem:[#allocation11 + $0x40] sm:$0xff]  ;;  %v3235_v15 = vpack.c.bf16 %v351_v4, %v348_v3  ;;  %v360_v16 = vand.u32 4294901760, %v3222_v7  ;;  %v363_v17 = vand.u32 4294901760, %v3224_v8  ;;  %v3239_v18 = vld [vmem:[#allocation11 + $0x48] sm:$0xff]  ;;  %v366_v22 = vand.u32 4294901760, %v3229_v11 }
  0x54   :  { %v3241_v19 = vld [vmem:[#allocation11 + $0x50] sm:$0xff]  ;;  %v3243_v20 = vld [vmem:[#allocation11 + $0x58] sm:$0xff]  ;;  %v3249_v21 = vpack.c.bf16 %v357_v10, %v354_v6  ;;  %v3252_v23 = vld [vmem:[#allocation11 + $0x60] sm:$0xff]  ;;  %v369_v25 = vand.u32 4294901760, %v3231_v12  ;;  %v372_v26 = vand.u32 4294901760, %v3233_v13  ;;  %v375_v27 = vand.u32 4294901760, %v3239_v18 }
  0x55   :  { %v3254_v24 = vld [vmem:[#allocation11 + $0x68] sm:$0xff]  ;;  %2533 = vmatprep.subr.bf16.mxu0 %v3235_v15  ;;  %v378_v28 = vand.u32 4294901760, %v3241_v19  ;;  %v381_v29 = vand.u32 4294901760, %v3243_v20  ;;  %v384_v30 = vand.u32 4294901760, %v3252_v23  ;;  %v3266_v31 = vld [vmem:[#allocation11 + $0x70] sm:$0xff]  ;;  %v3268_v32 = vand.u32 127, %v88_v14 }
  0x56   :  { %2535 = vmatpush3.bf16.msra.mxu0 %v3235_v15  ;;  %s3270_s22 = sld [smem:[#allocation4 + $0x2]]  ;;  %v3277_v33 = vpack.c.bf16 %v363_v17, %v360_v16  ;;  %v387_v34 = vand.u32 4294901760, %v3254_v24  ;;  %v3280_v35 = vld [vmem:[#allocation11 + $0x78] sm:$0xff]  ;;  %v91_v36 = vstv %s3216_s3  ;;  %s3283_s24 = sld [smem:[#allocation4 + $0x3]]  ;;  %v3292_v37 = vsub.f32 %v330_v0, %v348_v3 }
  0x57   :  { %2537 = vmatprep.subr.bf16.mxu0 %v3249_v21  ;;  %s3285_s26 = sld [smem:[#allocation4 + $0x4]]  ;;  %vm92_vm0 = vcmp.eq.s32.totalorder %v3268_v32, %v91_v36  ;;  %s3288_s27 = sld [smem:[#allocation4 + $0x5]]  ;;  %v3304_v39 = vpack.c.bf16 %v369_v25, %v366_v22  ;;  %v3310_v40 = vpack.c.bf16 %v375_v27, %v372_v26  ;;  %v390_v41 = vand.u32 4294901760, %v3266_v31 }
  0x58   :  { %s3290_s28 = sld [smem:[#allocation4 + $0x6]]  ;;  %v1844_v38 = vsel %vm92_vm0, 1.0, %v3106_v9  ;;  %s3295_s29 = sld [smem:[#allocation4 + $0x7]]  ;;  %v393_v42 = vand.u32 4294901760, %v3280_v35  ;;  %v3323_v43 = vpack.c.bf16 %v381_v29, %v378_v28  ;;  %v3329_v44 = vpack.c.bf16 %v387_v34, %v384_v30 }
  0x59   :  { %s3297_s30 = sld [smem:[#allocation4 + $0x8]]  ;;  %95 = vst [vmem:[#allocation2] sm:$0x1] %v1844_v38  ;;  %s3314_s0 = sld [smem:[#allocation4 + $0x9]]  ;;  %v107_v45 = vstv %s3261_s4  ;;  %v3333_v46 = vsub.f32 %v3212_v1, %v351_v4  ;;  %v451_v48 = vand.u32 4294901760, %v3292_v37  ;;  %v3345_v49 = vsub.f32 %v3214_v2, %v354_v6 }
  0x5a   :  { %2539 = vmatpush3.bf16.msra.mxu0 %v3249_v21  ;;  %s3316_s7 = sld [smem:[#allocation4 + $0xa]]  ;;  %vm108_vm1 = vcmp.eq.s32.totalorder %v3268_v32, %v107_v45  ;;  %s3338_s8 = sld [smem:[#allocation4 + $0xb]]  ;;  %v3373_v60 = vsub.f32 %v3219_v5, %v357_v10 }
  0x5b   :  { %2541 = vmatprep.subr.bf16.mxu0 %v3277_v33  ;;  %s3340_s9 = sld [smem:[#allocation4 + $0xc]]  ;;  %v1847_v50 = vsel %vm108_vm1, 1.0, %v3106_v9  ;;  %s3351_s11 = sld [smem:[#allocation4 + $0xd]]  ;;  %v458_v62 = vand.u32 4294901760, %v3333_v46  ;;  %v452_v3 = vsub.f32 %v3292_v37, %v451_v48 }
  0x5c   :  { %v123_v47 = vstv %s3270_s22  ;;  %v139_v51 = vstv %s3283_s24  ;;  %s3353_s25 = sld [smem:[#allocation4 + $0xe]]  ;;  %111 = vst [vmem:[#allocation2 + $0x1] sm:$0x1] %v1847_v50  ;;  %s3365_s12 = sld [smem:[#allocation4 + $0xf]] }
  0x5d   :  { %vm124_vm2 = vcmp.eq.s32.totalorder %v3268_v32, %v123_v47  ;;  %v155_v52 = vstv %s3285_s26  ;;  %vm140_vm3 = vcmp.eq.s32.totalorder %v3268_v32, %v139_v51  ;;  %v171_v54 = vstv %s3288_s27  ;;  %s3976_s13 = sld [smem:[#allocation10]]  ;;  %s3978_s14 = sld [smem:[#allocation10 + $0x1]] }
  0x5e   :  { %2543 = vmatpush3.bf16.msra.mxu0 %v3277_v33  ;;  %v1850_v53 = vsel %vm124_vm2, 1.0, %v3106_v9  ;;  %vm156_vm4 = vcmp.eq.s32.totalorder %v3268_v32, %v155_v52  ;;  %v1853_v55 = vsel %vm140_vm3, 1.0, %v3106_v9  ;;  %vm172_vm5 = vcmp.eq.s32.totalorder %v3268_v32, %v171_v54  ;;  %s3980_s15 = sld [smem:[#allocation4 + $0x9]]  ;;  %s3982_s16 = sld [smem:[#allocation4 + $0xa]] }
  0x5f   :  { %2545 = vmatprep.subr.bf16.mxu0 %v3304_v39  ;;  %127 = vst [vmem:[#allocation2 + $0x2] sm:$0x1] %v1850_v53  ;;  %v1856_v56 = vsel %vm156_vm4, 1.0, %v3106_v9  ;;  %v187_v57 = vstv %s3290_s28  ;;  %143 = vst [vmem:[#allocation2 + $0x3] sm:$0x1] %v1853_v55  ;;  %v1859_v58 = vsel %vm172_vm5, 1.0, %v3106_v9  ;;  %v203_v59 = vstv %s3295_s29 }
  0x60   :  { %159 = vst [vmem:[#allocation2 + $0x4] sm:$0x1] %v1856_v56  ;;  %vm188_vm6 = vcmp.eq.s32.totalorder %v3268_v32, %v187_v57  ;;  %175 = vst [vmem:[#allocation2 + $0x5] sm:$0x1] %v1859_v58  ;;  %vm204_vm7 = vcmp.eq.s32.totalorder %v3268_v32, %v203_v59  ;;  %v210_v63 = vstv %s3297_s30  ;;  %v226_v1 = vstv %s3314_s0  ;;  %s1845_s17 = sld [smem:[#allocation4 + $0x1]]  ;;  %s1848_s18 = sld [smem:[#allocation4 + $0x2]] }
  0x61   :  { %v1862_v61 = vsel %vm188_vm6, 1.0, %v3106_v9  ;;  %v1865_v0 = vsel %vm204_vm7, 1.0, %v3106_v9  ;;  %vm211_vm8 = vcmp.eq.s32.totalorder %v3268_v32, %v210_v63  ;;  %v242_v2 = vstv %s3316_s7  ;;  %s1851_s19 = sld [smem:[#allocation4 + $0x3]]  ;;  %s1854_s3 = sld [smem:[#allocation4 + $0x4]] }
  0x62   :  { %2547 = vmatpush3.bf16.msra.mxu0 %v3304_v39  ;;  %191 = vst [vmem:[#allocation2 + $0x6] sm:$0x1] %v1862_v61  ;;  %207 = vst [vmem:[#allocation2 + $0x7] sm:$0x1] %v1865_v0  ;;  %v1867_v4 = vsel %vm211_vm8, 1.0, %v3106_v9  ;;  %vm227_vm9 = vcmp.eq.s32.totalorder %v3268_v32, %v226_v1  ;;  %vm243_vm10 = vcmp.eq.s32.totalorder %v3268_v32, %v242_v2  ;;  %v258_v10 = vstv %s3338_s8  ;;  %s1857_s27 = sld [smem:[#allocation4 + $0x5]] }
  0x63   :  { %2549 = vmatprep.subr.bf16.mxu0 %v3310_v40  ;;  %214 = vst [vmem:[#allocation2 + $0x8] sm:$0x1] %v1867_v4  ;;  %v1871_v5 = vsel %vm227_vm9, 1.0, %v3106_v9  ;;  %v1875_v6 = vsel %vm243_vm10, 1.0, %v3106_v9  ;;  %v274_v14 = vstv %s3340_s9  ;;  %vm259_vm11 = vcmp.eq.s32.totalorder %v3268_v32, %v258_v10  ;;  %p97_p4 = scmp.le.s32.totalorder %s3976_s13, 0  ;;  %p113_p5 = scmp.le.s32.totalorder %s3976_s13, 1 }
  0x64   :  { %230 = vst [vmem:[#allocation2 + $0x9] sm:$0x1] %v1871_v5  ;;  %246 = vst [vmem:[#allocation2 + $0xa] sm:$0x1] %v1875_v6  ;;  %vm275_vm12 = vcmp.eq.s32.totalorder %v3268_v32, %v274_v14  ;;  %v290_v36 = vstv %s3351_s11  ;;  %v306_v38 = vstv %s3353_s25  ;;  %v1879_v45 = vsel %vm259_vm11, 1.0, %v3106_v9  ;;  %p129_p6 = scmp.le.s32.totalorder %s3976_s13, 2 }
  0x65   :  { %v1883_v47 = vsel %vm275_vm12, 1.0, %v3106_v9  ;;  %vm291_vm13 = vcmp.eq.s32.totalorder %v3268_v32, %v290_v36  ;;  %vm307_vm14 = vcmp.eq.s32.totalorder %v3268_v32, %v306_v38  ;;  %v459_v50 = vsub.f32 %v3333_v46, %v458_v62  ;;  %262 = vst [vmem:[#allocation2 + $0xb] sm:$0x1] %v1879_v45  ;;  %s98_s20 = scalar_select %p97_p4, 1, 0 }
  0x66   :  { %2551 = vmatpush3.bf16.msra.mxu0 %v3310_v40  ;;  %278 = vst [vmem:[#allocation2 + $0xc] sm:$0x1] %v1883_v47  ;;  %v1887_v51 = vsel %vm291_vm13, 1.0, %v3106_v9  ;;  %v1891_v52 = vsel %vm307_vm14, 1.0, %v3106_v9  ;;  %v322_v53 = vstv %s3365_s12  ;;  %v465_v55 = vand.u32 4294901760, %v3345_v49  ;;  %p145_p7 = scmp.le.s32.totalorder %s3976_s13, 3 }
  0x67   :  { %2553 = vmatprep.subr.bf16.mxu0 %v3323_v43  ;;  %294 = vst [vmem:[#allocation2 + $0xd] sm:$0x1] %v1887_v51  ;;  %310 = vst [vmem:[#allocation2 + $0xe] sm:$0x1] %v1891_v52  ;;  %vm323_vm15 = vcmp.eq.s32.totalorder %v3268_v32, %v322_v53  ;;  %v3417_v56 = vsub.f32 %v3222_v7, %v360_v16  ;;  %v3424_v57 = vpack.c.bf16 %v393_v42, %v390_v41  ;;  %s114_s21 = scalar_select %p113_p5, 1, 0 }
  0x68   :  { %v1895_v54 = vsel %vm323_vm15, 1.0, %v3106_v9  ;;  %v472_v59 = vand.u32 4294901760, %v3373_v60  ;;  %v453_v61 = vand.u32 4294901760, %v452_v3  ;;  %v460_v63 = vand.u32 4294901760, %v459_v50  ;;  %s99_s2 = scvt.s32.f32 %s98_s20  ;;  %p161_p8 = scmp.le.s32.totalorder %s3976_s13, 4 }
  0x69   :  { %v328_v58 = vld [vmem:[#allocation2] sm:$0xff]  ;;  %326 = vst [vmem:[#allocation2 + $0xf] sm:$0x1] %v1895_v54  ;;  %v3433_v7 = vsub.f32 %v3224_v8, %v363_v17  ;;  %v466_v0 = vsub.f32 %v3345_v49, %v465_v55  ;;  %v479_v1 = vand.u32 4294901760, %v3417_v56  ;;  %v3443_v2 = vsub.f32 %v3229_v11, %v366_v22  ;;  %s115_s23 = scvt.s32.f32 %s114_s21  ;;  %p177_p9 = scmp.le.s32.totalorder %s3976_s13, 5 }
  0x6a   :  { %2555 = vmatpush3.bf16.msra.mxu0 %v3323_v43  ;;  %v3428_v9 = vand.u32 4294901760, %v328_v58  ;;  %v473_v3 = vsub.f32 %v3373_v60, %v472_v59  ;;  %v2564_v17 = vpack.c.bf16 %v460_v63, %v453_v61  ;;  %v3461_v38 = vsub.f32 %v3231_v12, %v369_v25  ;;  %s130_s4 = scalar_select %p129_p6, 1, 0 }
  0x6b   :  { %2557 = vmatprep.subr.bf16.mxu0 %v3329_v44  ;;  %v486_v4 = vand.u32 4294901760, %v3433_v7  ;;  %v467_v10 = vand.u32 4294901760, %v466_v0  ;;  %v480_v11 = vsub.f32 %v3417_v56, %v479_v1  ;;  %v493_v22 = vand.u32 4294901760, %v3443_v2  ;;  %s146_s22 = scalar_select %p145_p7, 1, 0 }
  0x6c   :  { %v3436_v16 = vsub.f32 %v328_v58, %v3428_v9  ;;  %v474_v36 = vand.u32 4294901760, %v473_v3  ;;  %v3466_v45 = vsub.f32 %v3233_v13, %v372_v26  ;;  %v3472_v51 = vsub.f32 %v3239_v18, %v375_v27  ;;  %s131_s24 = scvt.s32.f32 %s130_s4  ;;  %s1860_s29 = sld [smem:[#allocation4 + $0x6]] }
  0x6d   :  { %v487_v50 = vsub.f32 %v3433_v7, %v486_v4  ;;  %v3477_v52 = vsub.f32 %v3241_v19, %v378_v28  ;;  %v3485_v13 = vsub.f32 %v3243_v20, %v381_v29  ;;  %v3490_v25 = vsub.f32 %v3252_v23, %v384_v30  ;;  %s147_s26 = scvt.s32.f32 %s146_s22  ;;  %p193_p10 = scmp.le.s32.totalorder %s3976_s13, 6 }
  0x6e   :  { %2559 = vmatpush3.bf16.msra.mxu0 %v3329_v44  ;;  %v430_v8 = vand.u32 4294901760, %v3436_v16  ;;  %v3495_v18 = vsub.f32 %v3254_v24, %v387_v34  ;;  %v481_v19 = vand.u32 4294901760, %v480_v11  ;;  %v3500_v26 = vsub.f32 %v3266_v31, %v390_v41  ;;  %s162_s28 = scalar_select %p161_p8, 1, 0 }
  0x6f   :  { %2561 = vmatprep.subr.bf16.mxu0 %v3424_v57  ;;  %v3505_v20 = vsub.f32 %v3280_v35, %v393_v42  ;;  %v494_v27 = vsub.f32 %v3443_v2, %v493_v22  ;;  %v500_v28 = vand.u32 4294901760, %v3461_v38  ;;  %v507_v24 = vand.u32 4294901760, %v3466_v45  ;;  %s178_s0 = scalar_select %p177_p9, 1, 0 }
  0x70   :  { %v431_v5 = vsub.f32 %v3436_v16, %v430_v8  ;;  %v329_v6 = vld [vmem:[#allocation2 + $0x8] sm:$0xff]  ;;  %v2568_v29 = vpack.c.bf16 %v474_v36, %v467_v10  ;;  %v488_v30 = vand.u32 4294901760, %v487_v50  ;;  %v514_v34 = vand.u32 4294901760, %v3472_v51  ;;  %s163_s30 = scvt.s32.f32 %s162_s28  ;;  %s1863_s9 = sld [smem:[#allocation4 + $0x7]] }
  0x71   :  { %v3456_v14 = vand.u32 4294901760, %v329_v6  ;;  %v521_v31 = vand.u32 4294901760, %v3477_v52  ;;  %v528_v35 = vand.u32 4294901760, %v3485_v13  ;;  %v535_v42 = vand.u32 4294901760, %v3490_v25  ;;  %s194_s7 = scalar_select %p193_p10, 1, 0 }
  0x72   :  { %2563 = vmatpush3.bf16.msra.mxu0 %v3424_v57  ;;  %v432_v47 = vand.u32 4294901760, %v431_v5  ;;  %v542_v53 = vand.u32 4294901760, %v3495_v18  ;;  %v549_v54 = vand.u32 4294901760, %v3500_v26  ;;  %v556_v58 = vand.u32 4294901760, %v3505_v20  ;;  %s179_s8 = scvt.s32.f32 %s178_s0  ;;  %p216_p11 = scmp.le.s32.totalorder %s3978_s14, 0 }
  0x73   :  { %2565 = vmatprep.subr.bf16.mxu0 %v2564_v17  ;;  %v3480_v12 = vsub.f32 %v329_v6, %v3456_v14  ;;  %v3525_v61 = vpack.c.bf16 %v458_v62, %v451_v48  ;;  %v3527_v63 = vpack.c.bf16 %v472_v59, %v465_v55  ;;  %v501_v3 = vsub.f32 %v3461_v38, %v500_v28  ;;  %s195_s11 = scvt.s32.f32 %s194_s7  ;;  %p232_p12 = scmp.le.s32.totalorder %s3978_s14, 1 }
  0x74   :  { %2144 = vmatprep.mubr.f32.mxu0 %v432_v47  ;;  %v3530_v5 = vpack.c.bf16 %v486_v4, %v479_v1  ;;  %v3532_v6 = vpack.c.bf16 %v500_v28, %v493_v22  ;;  %v3534_v10 = vpack.c.bf16 %v514_v34, %v507_v24  ;;  %v3536_v11 = vpack.c.bf16 %v528_v35, %v521_v31  ;;  %p248_p13 = scmp.le.s32.totalorder %s3978_s14, 2  ;;  %p264_p0 = scmp.le.s32.totalorder %s3978_s14, 3 }
  0x75   :  { %v440_v23 = vand.u32 4294901760, %v3480_v12  ;;  %v3538_v36 = vpack.c.bf16 %v542_v53, %v535_v42  ;;  %v3540_v47 = vpack.c.bf16 %v556_v58, %v549_v54  ;;  %v508_v48 = vsub.f32 %v3466_v45, %v507_v24  ;;  %s217_s25 = scalar_select %p216_p11, 1, 0 }
  0x76   :  { %v2572_v62 = vpack.c.bf16 %v488_v30, %v481_v19  ;;  %v495_v55 = vand.u32 4294901760, %v494_v27  ;;  %v502_v59 = vand.u32 4294901760, %v501_v3  ;;  %v515_v1 = vsub.f32 %v3472_v51, %v514_v34  ;;  %s233_s12 = scalar_select %p232_p12, 1, 0 }
  0x77   :  { %v441_v41 = vsub.f32 %v3480_v12, %v440_v23  ;;  %v509_v4 = vand.u32 4294901760, %v508_v48  ;;  %v522_v28 = vsub.f32 %v3477_v52, %v521_v31  ;;  %v543_v27 = vsub.f32 %v3495_v18, %v542_v53  ;;  %s218_s13 = scvt.s32.f32 %s217_s25  ;;  %s1881_s20 = sld [smem:[#allocation4 + $0xc]] }
  0x78   :  { %v2576_v22 = vpack.c.bf16 %v502_v59, %v495_v55  ;;  %v516_v50 = vand.u32 4294901760, %v515_v1  ;;  %v550_v3 = vsub.f32 %v3500_v26, %v549_v54  ;;  %v557_v31 = vsub.f32 %v3505_v20, %v556_v58  ;;  %v3556_v58 = vld [vmem:[#allocation14] sm:$0xff]  ;;  %v3558_v55 = vld [vmem:[#allocation14 + $0x8] sm:$0xff]  ;;  %v3560_v59 = vld [vmem:[#allocation14 + $0x10] sm:$0xff]  ;;  %p280_p1 = scmp.le.s32.totalorder %s3978_s14, 4  ;;  %p296_p2 = scmp.le.s32.totalorder %s3978_s14, 5 }
  0x79   :  { %v442_v0 = vand.u32 4294901760, %v441_v41  ;;  %v529_v41 = vsub.f32 %v3485_v13, %v528_v35  ;;  %v544_v34 = vand.u32 4294901760, %v543_v27  ;;  %v2596_v53 = vpack.c.bf16 %v3333_v46, %v3292_v37  ;;  %v3565_v46 = vld [vmem:[#allocation14 + $0x18] sm:$0xff]  ;;  %s1889_s22 = sld [smem:[#allocation4 + $0xe]]  ;;  %p312_p3 = scmp.le.s32.totalorder %s3978_s14, 6 }
  0x7a   :  { %v2580_v24 = vpack.c.bf16 %v516_v50, %v509_v4  ;;  %v551_v48 = vand.u32 4294901760, %v550_v3  ;;  %v2600_v54 = vpack.c.bf16 %v3373_v60, %v3345_v49  ;;  %v1048_v1 = vand.u32 4294901760, %v3556_v58  ;;  %v3568_v49 = vld [vmem:[#allocation14 + $0x20] sm:$0xff]  ;;  %v3570_v60 = vld [vmem:[#allocation14 + $0x28] sm:$0xff]  ;;  %s3107_s14 = smov [#allocation16]  }
  0x7b   :  { %2145 = vmatmul.mubr.f32.vlgmr.msra.gmra.mrb[0].mxu0 %v442_v0  ;;  %v523_v0 = vand.u32 4294901760, %v522_v28  ;;  %v530_v19 = vand.u32 4294901760, %v529_v41  ;;  %v1051_v37 = vand.u32 4294901760, %v3558_v55  ;;  %v1054_v4 = vand.u32 4294901760, %v3560_v59 }
  0x7c   :  { %2567 = vmatpush3.bf16.msra.mxu0 %v2564_v17  ;;  %2179 = vmatprep.mubr.f32.mxu0 %v3428_v9  ;;  %v536_v17 = vsub.f32 %v3490_v25, %v535_v42  ;;  %v558_v42 = vand.u32 4294901760, %v557_v31  ;;  %v1057_v50 = vand.u32 4294901760, %v3565_v46  ;;  %v1060_v41 = vand.u32 4294901760, %v3568_v49 }
  0x7d   :  { %2569 = vmatprep.subr.bf16.mxu0 %v2568_v29  ;;  %v3579_v28 = vpack.c.bf16 %v1051_v37, %v1048_v1  ;;  %vm1733_vm14 = vcmp.lt.s32.totalorder %v3268_v32, 13  ;;  %vm1766_vm15 = vcmask 7168  }
  0x7e   :  { %v537_v30 = vand.u32 4294901760, %v536_v17  ;;  %v1063_v17 = vand.u32 4294901760, %v3570_v60 }
  0x7f   :  { %2725 = vmatprep.subr.bf16.mxu1 %v3579_v28 }
  0x80   :  { %2571 = vmatpush3.bf16.msra.mxu0 %v2568_v29  ;;  %v2584_v29 = vpack.c.bf16 %v530_v19, %v523_v0  ;;  %v2588_v35 = vpack.c.bf16 %v544_v34, %v537_v30  ;;  %v3589_v0 = vld [vmem:[#allocation14 + $0x30] sm:$0xff]  ;;  %2727 = vmatpush3.bf16.msra.mxu1 %v3579_v28  ;;  %v3602_v19 = vpack.c.bf16 %v1063_v17, %v1060_v41  ;;  %v3608_v34 = vld [vmem:[#allocation14 + $0x48] sm:$0xff] }
  0x81   :  { %2573 = vmatprep.subr.bf16.mxu0 %v2572_v62  ;;  %v1066_v27 = vand.u32 4294901760, %v3589_v0  ;;  %v1075_v31 = vand.u32 4294901760, %v3608_v34 }
  0x84   :  { %2575 = vmatpush3.bf16.msra.mxu0 %v2572_v62  ;;  %v2592_v62 = vpack.c.bf16 %v558_v42, %v551_v48 }
  0x85   :  { %2577 = vmatprep.subr.bf16.mxu0 %v2576_v22 }
  0x88   :  { %2579 = vmatpush3.bf16.msra.mxu0 %v2576_v22  ;;  %v2604_v22 = vpack.c.bf16 %v3433_v7, %v3417_v56  ;;  %v3591_v56 = vld [vmem:[#allocation14 + $0x38] sm:$0xff]  ;;  %v2608_v7 = vpack.c.bf16 %v3461_v38, %v3443_v2  ;;  %v2612_v2 = vpack.c.bf16 %v3472_v51, %v3466_v45  ;;  %v2620_v51 = vpack.c.bf16 %v3495_v18, %v3490_v25 }
  0x89   :  { %2581 = vmatprep.subr.bf16.mxu0 %v2580_v24  ;;  %v1069_v30 = vand.u32 4294901760, %v3591_v56 }
  0x8b   :  { %v3618_v38 = vpack.c.bf16 %v1069_v30, %v1066_v27 }
  0x8c   :  { %2583 = vmatpush3.bf16.msra.mxu0 %v2580_v24  ;;  %v3587_v24 = vpack.c.bf16 %v1057_v50, %v1054_v4 }
  0x8d   :  { %2585 = vmatprep.subr.bf16.mxu0 %v2584_v29 }
  0x8e   :  { %2729 = vmatprep.subr.bf16.mxu1 %v3587_v24 }
  0x8f   :  { %2731 = vmatpush3.bf16.msra.mxu1 %v3587_v24 }
  0x90   :  { %2587 = vmatpush3.bf16.msra.mxu0 %v2584_v29  ;;  %v3606_v29 = vld [vmem:[#allocation14 + $0x40] sm:$0xff]  ;;  %2733 = vmatprep.subr.bf16.mxu1 %v3602_v19 }
  0x91   :  { %2589 = vmatprep.subr.bf16.mxu0 %v2588_v35  ;;  %v1072_v3 = vand.u32 4294901760, %v3606_v29 }
  0x93   :  { %2735 = vmatpush3.bf16.msra.mxu1 %v3602_v19  ;;  %v3630_v45 = vpack.c.bf16 %v1075_v31, %v1072_v3 }
  0x94   :  { %2591 = vmatpush3.bf16.msra.mxu0 %v2588_v35  ;;  %v2616_v35 = vpack.c.bf16 %v3485_v13, %v3477_v52  ;;  %2737 = vmatprep.subr.bf16.mxu1 %v3618_v38  ;;  %v2624_v52 = vpack.c.bf16 %v3505_v20, %v3500_v26  ;;  %v1046_v13 = vld [vmem:[#allocation14 + $0x78] sm:$0xff] }
  0x95   :  { %2593 = vmatprep.subr.bf16.mxu0 %v2592_v62  ;;  %v1093_v18 = vand.u32 4294901760, %v1046_v13 }
  0x97   :  { %2739 = vmatpush3.bf16.msra.mxu1 %v3618_v38 }
  0x98   :  { %2595 = vmatpush3.bf16.msra.mxu0 %v2592_v62  ;;  %2741 = vmatprep.subr.bf16.mxu1 %v3630_v45 }
  0x99   :  { %2597 = vmatprep.subr.bf16.mxu0 %v2596_v53 }
  0x9b   :  { %2180 = vmatmul.mubr.f32.vlgmr.msra.gmra.mrb[0].mxu0 %v3456_v14  ;;  %2743 = vmatpush3.bf16.msra.mxu1 %v3630_v45 }
  0x9c   :  { %2599 = vmatpush3.bf16.msra.mxu0 %v2596_v53  ;;  %2214 = vmatprep.mubr.f32.mxu0 %v3436_v16  ;;  %v1044_v16 = vld [vmem:[#allocation14 + $0x68] sm:$0xff] }
  0x9d   :  { %2601 = vmatprep.subr.bf16.mxu0 %v2600_v54 }
  0xa0   :  { %2603 = vmatpush3.bf16.msra.mxu0 %v2600_v54 }
  0xa1   :  { %2605 = vmatprep.subr.bf16.mxu0 %v2604_v22 }
  0xa4   :  { %2607 = vmatpush3.bf16.msra.mxu0 %v2604_v22 }
  0xa5   :  { %2609 = vmatprep.subr.bf16.mxu0 %v2608_v7 }
  0xa8   :  { %2611 = vmatpush3.bf16.msra.mxu0 %v2608_v7 }
  0xa9   :  { %2613 = vmatprep.subr.bf16.mxu0 %v2612_v2 }
  0xac   :  { %2615 = vmatpush3.bf16.msra.mxu0 %v2612_v2 }
  0xad   :  { %2617 = vmatprep.subr.bf16.mxu0 %v2616_v35 }
  0xb0   :  { %2619 = vmatpush3.bf16.msra.mxu0 %v2616_v35  ;;  %v3754_v35 = vsub.f32 %v1046_v13, %v1093_v18 }
  0xb1   :  { %2621 = vmatprep.subr.bf16.mxu0 %v2620_v51 }
  0xb4   :  { %2623 = vmatpush3.bf16.msra.mxu0 %v2620_v51 }
  0xb5   :  { %2625 = vmatprep.subr.bf16.mxu0 %v2624_v52 }
  0xb8   :  { %2627 = vmatpush3.bf16.msra.mxu0 %v2624_v52 }
  0xb9   :  { %2629 = vmatprep.subr.bf16.mxu0 %v3235_v15 }
  0xbb   :  { %2215 = vmatmul.mubr.f32.vlgmr.msra.gmra.mrb[0].mxu0 %v3480_v12  ;;  %v1045_v12 = vld [vmem:[#allocation14 + $0x70] sm:$0xff] }
  0xbc   :  { %2631 = vmatpush3.bf16.msra.mxu0 %v3235_v15  ;;  %2249 = vmatprep.mubr.f32.mxu0 %v430_v8  ;;  %v1087_v8 = vand.u32 4294901760, %v1044_v16  ;;  %v1090_v25 = vand.u32 4294901760, %v1045_v12 }
  0xbd   :  { %2633 = vmatprep.subr.bf16.mxu0 %v3249_v21 }
  0xbe   :  { %v3743_v54 = vsub.f32 %v1044_v16, %v1087_v8  ;;  %v3752_v2 = vsub.f32 %v1045_v12, %v1090_v25 }
  0xc0   :  { %2635 = vmatpush3.bf16.msra.mxu0 %v3249_v21 }
  0xc1   :  { %2637 = vmatprep.subr.bf16.mxu0 %v3277_v33 }
  0xc4   :  { %2639 = vmatpush3.bf16.msra.mxu0 %v3277_v33 }
  0xc5   :  { %2641 = vmatprep.subr.bf16.mxu0 %v3304_v39 }
  0xc8   :  { %2643 = vmatpush3.bf16.msra.mxu0 %v3304_v39 }
  0xc9   :  { %2645 = vmatprep.subr.bf16.mxu0 %v3310_v40 }
  0xcc   :  { %2647 = vmatpush3.bf16.msra.mxu0 %v3310_v40 }
  0xcd   :  { %2649 = vmatprep.subr.bf16.mxu0 %v3323_v43 }
  0xd0   :  { %2651 = vmatpush3.bf16.msra.mxu0 %v3323_v43 }
  0xd1   :  { %2653 = vmatprep.subr.bf16.mxu0 %v3329_v44 }
  0xd4   :  { %2655 = vmatpush3.bf16.msra.mxu0 %v3329_v44 }
  0xd5   :  { %2657 = vmatprep.subr.bf16.mxu0 %v3424_v57 }
  0xd8   :  { %2659 = vmatpush3.bf16.msra.mxu0 %v3424_v57 }
  0xd9   :  { %2661 = vmatprep.subr.bf16.mxu0 %v3525_v61 }
  0xdb   :  { %2250 = vmatmul.mubr.f32.vlgmr.msra.gmra.mrb[0].mxu0 %v440_v23  ;;  %v3716_v23 = vpack.c.bf16 %v1093_v18, %v1090_v25 }
  0xdc   :  { %2663 = vmatpush3.bf16.msra.mxu0 %v3525_v61  ;;  %2284 = vmatprep.mubr.f32.mxu0 %v3428_v9 }
  0xdd   :  { %2665 = vmatprep.subr.bf16.mxu0 %v3527_v63 }
  0xe0   :  { %2667 = vmatpush3.bf16.msra.mxu0 %v3527_v63 }
  0xe1   :  { %2669 = vmatprep.subr.bf16.mxu0 %v3530_v5 }
  0xe4   :  { %2671 = vmatpush3.bf16.msra.mxu0 %v3530_v5 }
  0xe5   :  { %2673 = vmatprep.subr.bf16.mxu0 %v3532_v6 }
  0xe8   :  { %2675 = vmatpush3.bf16.msra.mxu0 %v3532_v6 }
  0xe9   :  { %2677 = vmatprep.subr.bf16.mxu0 %v3534_v10 }
  0xec   :  { %2679 = vmatpush3.bf16.msra.mxu0 %v3534_v10 }
  0xed   :  { %2681 = vmatprep.subr.bf16.mxu0 %v3536_v11 }
  0xf0   :  { %2683 = vmatpush3.bf16.msra.mxu0 %v3536_v11 }
  0xf1   :  { %2685 = vmatprep.subr.bf16.mxu0 %v3538_v36 }
  0xf4   :  { %2687 = vmatpush3.bf16.msra.mxu0 %v3538_v36 }
  0xf5   :  { %2689 = vmatprep.subr.bf16.mxu0 %v3540_v47 }
  0xf8   :  { %2691 = vmatpush3.bf16.msra.mxu0 %v3540_v47 }
  0xf9   :  { %2693 = vmatprep.subr.bf16.mxu0 %v3235_v15 }
  0xfb   :  { %2285 = vmatmul.mubr.f32.vlgmr.msra.gmra.mrb[0].mxu0 %v3456_v14 }
  0xfc   :  { %2695 = vmatpush3.bf16.msra.mxu0 %v3235_v15  ;;  %2319 = vmatprep.mubr.f32.mxu0 %v3428_v9  ;;  %v1041_v15 = vld [vmem:[#allocation14 + $0x50] sm:$0xff] }
  0xfd   :  { %2697 = vmatprep.subr.bf16.mxu0 %v3249_v21 }
 0x100   :  { %2699 = vmatpush3.bf16.msra.mxu0 %v3249_v21  ;;  %v1042_v21 = vld [vmem:[#allocation14 + $0x58] sm:$0xff] }
 0x101   :  { %2701 = vmatprep.subr.bf16.mxu0 %v3277_v33 }
 0x104   :  { %2703 = vmatpush3.bf16.msra.mxu0 %v3277_v33  ;;  %v1078_v33 = vand.u32 4294901760, %v1041_v15 }
 0x105   :  { %2705 = vmatprep.subr.bf16.mxu0 %v3304_v39 }
 0x106   :  { %v3729_v11 = vsub.f32 %v1041_v15, %v1078_v33  ;;  %v4052_v15 = vand.u32 4294901760, %v3752_v2 }
 0x108   :  { %2707 = vmatpush3.bf16.msra.mxu0 %v3304_v39  ;;  %v1081_v39 = vand.u32 4294901760, %v1042_v21  ;;  %v1221_v47 = vand.u32 4294901760, %v3729_v11 }
 0x109   :  { %2709 = vmatprep.subr.bf16.mxu0 %v3310_v40 }
 0x10a   :  { %v3696_v9 = vpack.c.bf16 %v1081_v39, %v1078_v33  ;;  %v3731_v36 = vsub.f32 %v1042_v21, %v1081_v39  ;;  %v1222_v42 = vsub.f32 %v3729_v11, %v1221_v47  ;;  %v4051_v21 = vand.u32 4294901760, %v3754_v35 }
 0x10b   :  { %v1250_v39 = vsub.f32 %v3752_v2, %v4052_v15 }
 0x10c   :  { %2711 = vmatpush3.bf16.msra.mxu0 %v3310_v40  ;;  %v1043_v40 = vld [vmem:[#allocation14 + $0x60] sm:$0xff]  ;;  %2745 = vmatprep.subr.bf16.mxu1 %v3696_v9  ;;  %v4055_v48 = vand.u32 4294901760, %v3731_v36  ;;  %v3777_v25 = vpack.c.bf16 %v3731_v36, %v3729_v11 }
 0x10d   :  { %2713 = vmatprep.subr.bf16.mxu0 %v3323_v43  ;;  %2747 = vmatpush3.bf16.msra.mxu1 %v3696_v9 }
 0x10e   :  { %v1229_v62 = vsub.f32 %v3731_v36, %v4055_v48 }
 0x110   :  { %2715 = vmatpush3.bf16.msra.mxu0 %v3323_v43  ;;  %v1084_v43 = vand.u32 4294901760, %v1043_v40 }
 0x111   :  { %2717 = vmatprep.subr.bf16.mxu0 %v3329_v44 }
 0x112   :  { %v3741_v53 = vsub.f32 %v1043_v40, %v1084_v43  ;;  %v1257_v40 = vsub.f32 %v3754_v35, %v4051_v21 }
 0x114   :  { %2719 = vmatpush3.bf16.msra.mxu0 %v3329_v44  ;;  %v3700_v44 = vpack.c.bf16 %v1087_v8, %v1084_v43  ;;  %v1251_v43 = vand.u32 4294901760, %v1250_v39  ;;  %v1258_v8 = vand.u32 4294901760, %v1257_v40  ;;  %v3781_v18 = vpack.c.bf16 %v3743_v54, %v3741_v53 }
 0x115   :  { %2721 = vmatprep.subr.bf16.mxu0 %v3424_v57  ;;  %v3832_v39 = vsub.f32 %v3591_v56, %v1069_v30 }
 0x116   :  { %2749 = vmatprep.subr.bf16.mxu1 %v3700_v44  ;;  %v3769_v12 = vpack.c.bf16 %v1258_v8, %v1251_v43 }
 0x117   :  { %2751 = vmatpush3.bf16.msra.mxu1 %v3700_v44 }
 0x118   :  { %2723 = vmatpush3.bf16.msra.mxu0 %v3424_v57  ;;  %v3705_v57 = vsub.f32 %v3556_v58, %v1048_v1  ;;  %2753 = vmatprep.subr.bf16.mxu1 %v3716_v23  ;;  %v1223_v58 = vand.u32 4294901760, %v1222_v42  ;;  %v4054_v1 = vand.u32 4294901760, %v3741_v53 }
 0x11a   :  { %v1151_v26 = vand.u32 4294901760, %v3705_v57  ;;  %v1236_v7 = vsub.f32 %v3741_v53, %v4054_v1 }
 0x11b   :  { %2320 = vmatmul.mubr.f32.vlgmr.msra.gmra.mrb[0].mxu0 %v3456_v14  ;;  %v3710_v14 = vsub.f32 %v3558_v55, %v1051_v37  ;;  %2755 = vmatpush3.bf16.msra.mxu1 %v3716_v23  ;;  %v1230_v55 = vand.u32 4294901760, %v1229_v62  ;;  %v4053_v37 = vand.u32 4294901760, %v3743_v54 }
 0x11c   :  { %v1152_v61 = vsub.f32 %v3705_v57, %v1151_v26  ;;  %v1237_v52 = vand.u32 4294901760, %v1236_v7 }
 0x11d   :  { %v1158_v20 = vand.u32 4294901760, %v3710_v14  ;;  %v3747_v22 = vpack.c.bf16 %v1230_v55, %v1223_v58  ;;  %v1243_v51 = vsub.f32 %v3743_v54, %v4053_v37  ;;  %v3773_v13 = vpack.c.bf16 %v3710_v14, %v3705_v57 }
 0x11e   :  { %v1153_v5 = vand.u32 4294901760, %v1152_v61  ;;  %v3785_v61 = vpack.c.bf16 %v3754_v35, %v3752_v2  ;;  %v3802_v55 = vsub.f32 %v3568_v49, %v1060_v41 }
 0x11f   :  { %v1159_v63 = vsub.f32 %v3710_v14, %v1158_v20  ;;  %v1244_v33 = vand.u32 4294901760, %v1243_v51 }
 0x120   :  { %v1179_v41 = vand.u32 4294901760, %v3802_v55 }
 0x121   :  { %v1160_v6 = vand.u32 4294901760, %v1159_v63  ;;  %v3767_v16 = vpack.c.bf16 %v1244_v33, %v1237_v52  ;;  %v3790_v63 = vsub.f32 %v3560_v59, %v1054_v4  ;;  %v3807_v59 = vsub.f32 %v3570_v60, %v1063_v17 }
 0x122   :  { %v3824_v17 = vsub.f32 %v3589_v0, %v1066_v27  ;;  %v1180_v0 = vsub.f32 %v3802_v55, %v1179_v41 }
 0x123   :  { %v3726_v10 = vpack.c.bf16 %v1160_v6, %v1153_v5  ;;  %v3795_v5 = vsub.f32 %v3565_v46, %v1057_v50  ;;  %v346_v6 = vld [vmem:[#allocation12] sm:$0xff]  ;;  %v1165_v42 = vand.u32 4294901760, %v3790_v63  ;;  %v1186_v60 = vand.u32 4294901760, %v3807_v59 }
 0x124   :  { %v1193_v56 = vand.u32 4294901760, %v3824_v17  ;;  %v1181_v15 = vand.u32 4294901760, %v1180_v0 }
 0x125   :  { %2757 = vmatprep.subr.bf16.mxu1 %v3726_v10  ;;  %v1172_v62 = vand.u32 4294901760, %v3795_v5  ;;  %v1166_v51 = vsub.f32 %v3790_v63, %v1165_v42  ;;  %v1187_v27 = vsub.f32 %v3807_v59, %v1186_v60  ;;  %v2860_v57 = vpack.c.bf16 %v1186_v60, %v1179_v41 }
 0x126   :  { %v1194_v1 = vsub.f32 %v3824_v17, %v1193_v56  ;;  %v199_v41 = vstv %s195_s11  ;;  %v197_v60 = vstv %s1863_s9 }
 0x127   :  { %v1173_v52 = vsub.f32 %v3795_v5, %v1172_v62  ;;  %v1167_v8 = vand.u32 4294901760, %v1166_v51  ;;  %v1188_v37 = vand.u32 4294901760, %v1187_v27  ;;  %vm198_vm8 = vcmp.eq.s32.totalorder %v3268_v32, %v197_v60 }
 0x1ee   :  { %v2321_v58 = vpop.f32.mrb[0].mxu0 }
 0x1ef   :  { %v2916_v4 = vadd.f32 %v2321_v58, %v346_v6  ;;  %v1021_v7 = vpop.f32.mrb[1].mxu0 }
 0x1f0   :  { %v2917_v46 = vadd.f32 %v1021_v7, %v346_v6  ;;  %v1174_v6 = vand.u32 4294901760, %v1173_v52  ;;  %v3853_v7 = vsub.f32 %v3606_v29, %v1072_v3 }
 0x1f1   :  { %v3809_v50 = vand.u32 4294901760, %v2916_v4 }
 0x1f2   :  { %v3817_v49 = vand.u32 4294901760, %v2917_v46  ;;  %v2760_v52 = vpack.c.bf16 %v1174_v6, %v1167_v8  ;;  %v1195_v8 = vand.u32 4294901760, %v1194_v1  ;;  %v2792_v1 = vpack.c.bf16 %v3795_v5, %v3790_v63 }
 0x1f3   :  { %v3827_v33 = vsub.f32 %v2916_v4, %v3809_v50  ;;  %v1200_v4 = vand.u32 4294901760, %v3832_v39  ;;  %v4059_v63 = vand.u32 4294901760, %v3752_v2  ;;  %v4060_v5 = vand.u32 4294901760, %v3754_v35 }
 0x1f4   :  { %v3835_v40 = vsub.f32 %v2917_v46, %v3817_v49  ;;  %v3858_v46 = vsub.f32 %v3608_v34, %v1075_v31  ;;  %v1207_v34 = vand.u32 4294901760, %v3853_v7  ;;  %v2764_v31 = vpack.c.bf16 %v1188_v37, %v1181_v15 }
 0x1f5   :  { %v1140_v43 = vand.u32 4294901760, %v3827_v33  ;;  %v1201_v29 = vsub.f32 %v3832_v39, %v1200_v4  ;;  %v2796_v37 = vpack.c.bf16 %v3807_v59, %v3802_v55  ;;  %v2864_v14 = vpack.c.bf16 %v1200_v4, %v1193_v56 }
 0x1f6   :  { %v1130_v58 = vand.u32 4294901760, %v3835_v40  ;;  %v1214_v3 = vand.u32 4294901760, %v3858_v46  ;;  %v1208_v0 = vsub.f32 %v3853_v7, %v1207_v34  ;;  %v2804_v15 = vpack.c.bf16 %v3858_v46, %v3853_v7 }
 0x1f7   :  { %v1141_v30 = vsub.f32 %v3827_v33, %v1140_v43  ;;  %v1202_v6 = vand.u32 4294901760, %v1201_v29  ;;  %v165_v2 = vstv %s1857_s27  ;;  %v183_v55 = vstv %s179_s8  ;;  %s313_s27 = scalar_select %p312_p3, 1, 0 }
 0x1f8   :  { %v1131_v51 = vsub.f32 %v3835_v40, %v1130_v58  ;;  %v1215_v27 = vsub.f32 %v3858_v46, %v1214_v3  ;;  %vm166_vm4 = vcmp.eq.s32.totalorder %v3268_v32, %v165_v2  ;;  %v220_v59 = vstv %s3980_s15  ;;  %s249_s15 = scalar_select %p248_p13, 1, 0 }
 0x1f9   :  { %v1142_v48 = vand.u32 4294901760, %v1141_v30  ;;  %vm221_vm6 = vcmp.eq.s32.totalorder %v3268_v32, %v220_v59  ;;  %v268_v46 = vstv %s1881_s20  ;;  %s314_s28 = scvt.s32.f32 %s313_s27 }
 0x1fa   :  { %v1132_v21 = vand.u32 4294901760, %v1131_v51  ;;  %v1216_v30 = vand.u32 4294901760, %v1215_v27  ;;  %vm269_vm10 = vcmp.eq.s32.totalorder %v3268_v32, %v268_v46 }
 0x1fc   :  { %2354 = vmatprep.mubr.f32.mxu1 %v1132_v21  ;;  %v2768_v21 = vpack.c.bf16 %v1202_v6, %v1195_v8  ;;  %v318_v8 = vstv %s314_s28 }
 0x1fd   :  { %2355 = vmatmul.mubr.f32.vlgmr.msra.gmra.mrb[0].mxu1 %v1142_v48  ;;  %v1209_v48 = vand.u32 4294901760, %v1208_v0 }
 0x1fe   :  { %2759 = vmatpush3.bf16.msra.mxu1 %v3726_v10  ;;  %2389 = vmatprep.mubr.f32.mxu1 %v3817_v49 }
 0x1ff   :  { %2761 = vmatprep.subr.bf16.mxu1 %v2760_v52  ;;  %v2772_v10 = vpack.c.bf16 %v1216_v30, %v1209_v48 }
 0x202   :  { %2763 = vmatpush3.bf16.msra.mxu1 %v2760_v52 }
 0x203   :  { %2765 = vmatprep.subr.bf16.mxu1 %v2764_v31 }
 0x206   :  { %2767 = vmatpush3.bf16.msra.mxu1 %v2764_v31  ;;  %v300_v31 = vstv %s1889_s22 }
 0x207   :  { %2769 = vmatprep.subr.bf16.mxu1 %v2768_v21  ;;  %vm301_vm12 = vcmp.eq.s32.totalorder %v3268_v32, %v300_v31 }
 0x20a   :  { %2771 = vmatpush3.bf16.msra.mxu1 %v2768_v21 }
 0x20b   :  { %2773 = vmatprep.subr.bf16.mxu1 %v2772_v10 }
 0x20e   :  { %2775 = vmatpush3.bf16.msra.mxu1 %v2772_v10 }
 0x20f   :  { %2777 = vmatprep.subr.bf16.mxu1 %v3747_v22 }
 0x212   :  { %2779 = vmatpush3.bf16.msra.mxu1 %v3747_v22  ;;  %v2800_v22 = vpack.c.bf16 %v3832_v39, %v3824_v17  ;;  %v222_v17 = vstv %s218_s13 }
 0x213   :  { %2781 = vmatprep.subr.bf16.mxu1 %v3767_v16  ;;  %v223_v39 = vsel %vm221_vm6, %v222_v17, 0.0 }
 0x214   :  { %224 = vst [vmem:[#allocation3 + $0x8] sm:$0x1] %v223_v39 }
 0x216   :  { %2783 = vmatpush3.bf16.msra.mxu1 %v3767_v16  ;;  %v2852_v16 = vpack.c.bf16 %v1158_v20, %v1151_v26  ;;  %v2868_v26 = vpack.c.bf16 %v1214_v3, %v1207_v34  ;;  %v4056_v20 = vand.u32 4294901760, %v3731_v36  ;;  %v149_v36 = vstv %s1854_s3  ;;  %s297_s3 = scalar_select %p296_p2, 1, 0 }
 0x217   :  { %2785 = vmatprep.subr.bf16.mxu1 %v3769_v12  ;;  %vm150_vm3 = vcmp.eq.s32.totalorder %v3268_v32, %v149_v36 }
 0x21a   :  { %2787 = vmatpush3.bf16.msra.mxu1 %v3769_v12  ;;  %v2856_v12 = vpack.c.bf16 %v1172_v62, %v1165_v42  ;;  %v2880_v42 = vpack.c.bf16 %v4060_v5, %v4059_v63  ;;  %v181_v62 = vstv %s1860_s29  ;;  %s1824_s29 = sshll.u32 %s3107_s14, 4  ;;  %s1825_s29 = int_to_ptr.vmem [resolvable:$true] %s1824_s29 }
 0x21b   :  { %2789 = vmatprep.subr.bf16.mxu1 %v3773_v13  ;;  %vm182_vm5 = vcmp.eq.s32.totalorder %v3268_v32, %v181_v62  ;;  %p3060_p5 = scmp.lt.s32.totalorder %s1825_s29, %s1825_s29 }
 0x21d   :  { %2390 = vmatmul.mubr.f32.vlgmr.msra.gmra.mrb[0].mxu1 %v3809_v50 }
 0x21e   :  { %2791 = vmatpush3.bf16.msra.mxu1 %v3773_v13  ;;  %2424 = vmatprep.mubr.f32.mxu1 %v3835_v40  ;;  %v2872_v13 = vpack.c.bf16 %v4056_v20, %v1221_v47  ;;  %v151_v47 = vstv %s147_s26  ;;  %s1893_s26 = sld [smem:[#allocation4 + $0xf]] }
 0x21f   :  { %2793 = vmatprep.subr.bf16.mxu1 %v2792_v1 }
 0x222   :  { %2795 = vmatpush3.bf16.msra.mxu1 %v2792_v1 }
 0x223   :  { %2797 = vmatprep.subr.bf16.mxu1 %v2796_v37 }
 0x224   :  { %v316_v0 = vstv %s1893_s26 }
 0x225   :  { %vm317_vm13 = vcmp.eq.s32.totalorder %v3268_v32, %v316_v0 }
 0x226   :  { %2799 = vmatpush3.bf16.msra.mxu1 %v2796_v37  ;;  %v319_v27 = vsel %vm317_vm13, %v318_v8, 0.0 }
 0x227   :  { %2801 = vmatprep.subr.bf16.mxu1 %v2800_v22  ;;  %320 = vst [vmem:[#allocation3 + $0xe] sm:$0x1] %v319_v27 }
 0x22a   :  { %2803 = vmatpush3.bf16.msra.mxu1 %v2800_v22 }
 0x22b   :  { %2805 = vmatprep.subr.bf16.mxu1 %v2804_v15 }
 0x22e   :  { %2807 = vmatpush3.bf16.msra.mxu1 %v2804_v15 }
 0x22f   :  { %2809 = vmatprep.subr.bf16.mxu1 %v3777_v25 }
 0x232   :  { %2811 = vmatpush3.bf16.msra.mxu1 %v3777_v25  ;;  %v4057_v25 = vand.u32 4294901760, %v3741_v53  ;;  %v152_v53 = vsel %vm150_vm3, %v151_v47, 0.0 }
 0x233   :  { %2813 = vmatprep.subr.bf16.mxu1 %v3781_v18  ;;  %153 = vst [vmem:[#allocation3 + $0x3] sm:$0x1] %v152_v53 }
 0x236   :  { %2815 = vmatpush3.bf16.msra.mxu1 %v3781_v18  ;;  %v4058_v18 = vand.u32 4294901760, %v3743_v54  ;;  %v167_v54 = vstv %s163_s30  ;;  %s3055_s30 = scalar_lea.vmem %s1825_s29, 256 }
 0x237   :  { %2817 = vmatprep.subr.bf16.mxu1 %v3785_v61  ;;  %v168_v35 = vsel %vm166_vm4, %v167_v54, 0.0  ;;  %p3056_p4 = scmp.ne.s32.totalorder %s1825_s29, %s3055_s30  ;;  %p3061_p6 = scmp.lt.s32.totalorder %s3055_s30, %s3055_s30 }
 0x238   :  { %169 = vst [vmem:[#allocation3 + $0x4] sm:$0x1] %v168_v35 }
 0x239   :  { %p3062_p7 = por %p3061_p6, %p3060_p5 }
 0x23a   :  { %2819 = vmatpush3.bf16.msra.mxu1 %v3785_v61  ;;  %v2876_v61 = vpack.c.bf16 %v4058_v18, %v4057_v25 }
 0x23b   :  { %2821 = vmatprep.subr.bf16.mxu1 %v3579_v28  ;;  %p3063_p8 = pnand %p3062_p7, %p3056_p4 }
 0x23d   :  { %2425 = vmatmul.mubr.f32.vlgmr.msra.gmra.mrb[0].mxu1 %v3827_v33  ;;  %v200_v33 = vsel %vm198_vm8, %v199_v41, 0.0 }
 0x23e   :  { %2823 = vmatpush3.bf16.msra.mxu1 %v3579_v28  ;;  %2459 = vmatprep.mubr.f32.mxu1 %v1130_v58  ;;  %201 = vst [vmem:[#allocation3 + $0x6] sm:$0x1] %v200_v33 }
 0x23f   :  { %2825 = vmatprep.subr.bf16.mxu1 %v3587_v24 }
 0x242   :  { %2827 = vmatpush3.bf16.msra.mxu1 %v3587_v24 }
 0x243   :  { %2829 = vmatprep.subr.bf16.mxu1 %v3602_v19 }
 0x246   :  { %2831 = vmatpush3.bf16.msra.mxu1 %v3602_v19 }
 0x247   :  { %2833 = vmatprep.subr.bf16.mxu1 %v3618_v38 }
 0x24a   :  { %2835 = vmatpush3.bf16.msra.mxu1 %v3618_v38 }
 0x24b   :  { %2837 = vmatprep.subr.bf16.mxu1 %v3630_v45 }
 0x24e   :  { %2839 = vmatpush3.bf16.msra.mxu1 %v3630_v45 }
 0x24f   :  { %2841 = vmatprep.subr.bf16.mxu1 %v3696_v9 }
 0x252   :  { %2843 = vmatpush3.bf16.msra.mxu1 %v3696_v9 }
 0x253   :  { %2845 = vmatprep.subr.bf16.mxu1 %v3700_v44 }
 0x256   :  { %2847 = vmatpush3.bf16.msra.mxu1 %v3700_v44 }
 0x257   :  { %2849 = vmatprep.subr.bf16.mxu1 %v3716_v23 }
 0x25a   :  { %2851 = vmatpush3.bf16.msra.mxu1 %v3716_v23 }
 0x25b   :  { %2853 = vmatprep.subr.bf16.mxu1 %v2852_v16 }
 0x25d   :  { %2460 = vmatmul.mubr.f32.vlgmr.msra.gmra.mrb[0].mxu1 %v1140_v43 }
 0x25e   :  { %2855 = vmatpush3.bf16.msra.mxu1 %v2852_v16  ;;  %2494 = vmatprep.mubr.f32.mxu1 %v3817_v49 }
 0x25f   :  { %2857 = vmatprep.subr.bf16.mxu1 %v2856_v12 }
 0x262   :  { %2859 = vmatpush3.bf16.msra.mxu1 %v2856_v12 }
 0x263   :  { %2861 = vmatprep.subr.bf16.mxu1 %v2860_v57 }
 0x266   :  { %2863 = vmatpush3.bf16.msra.mxu1 %v2860_v57 }
 0x267   :  { %2865 = vmatprep.subr.bf16.mxu1 %v2864_v14 }
 0x26a   :  { %2867 = vmatpush3.bf16.msra.mxu1 %v2864_v14 }
 0x26b   :  { %2869 = vmatprep.subr.bf16.mxu1 %v2868_v26 }
 0x26e   :  { %2871 = vmatpush3.bf16.msra.mxu1 %v2868_v26 }
 0x26f   :  { %2873 = vmatprep.subr.bf16.mxu1 %v2872_v13 }
 0x272   :  { %2875 = vmatpush3.bf16.msra.mxu1 %v2872_v13 }
 0x273   :  { %2877 = vmatprep.subr.bf16.mxu1 %v2876_v61 }
 0x276   :  { %2879 = vmatpush3.bf16.msra.mxu1 %v2876_v61 }
 0x277   :  { %2881 = vmatprep.subr.bf16.mxu1 %v2880_v42 }
 0x27a   :  { %2883 = vmatpush3.bf16.msra.mxu1 %v2880_v42 }
 0x27b   :  { %2885 = vmatprep.subr.bf16.mxu1 %v3579_v28 }
 0x27d   :  { %2495 = vmatmul.mubr.f32.vlgmr.msra.gmra.mrb[0].mxu1 %v3809_v50 }
 0x27e   :  { %2887 = vmatpush3.bf16.msra.mxu1 %v3579_v28  ;;  %2529 = vmatprep.mubr.f32.mxu1 %v3817_v49  ;;  %v101_v28 = vstv %s1845_s17  ;;  %v184_v49 = vsel %vm182_vm5, %v183_v55, 0.0  ;;  %s1877_s17 = sld [smem:[#allocation4 + $0xb]] }
 0x27f   :  { %2889 = vmatprep.subr.bf16.mxu1 %v3587_v24  ;;  %vm102_vm0 = vcmp.eq.s32.totalorder %v3268_v32, %v101_v28  ;;  %185 = vst [vmem:[#allocation3 + $0x5] sm:$0x1] %v184_v49 }
 0x282   :  { %2891 = vmatpush3.bf16.msra.mxu1 %v3587_v24  ;;  %v117_v24 = vstv %s1848_s18  ;;  %s234_s18 = scvt.s32.f32 %s233_s12 }
 0x283   :  { %2893 = vmatprep.subr.bf16.mxu1 %v3602_v19  ;;  %vm118_vm1 = vcmp.eq.s32.totalorder %v3268_v32, %v117_v24 }
 0x284   :  { %v238_v40 = vstv %s234_s18  ;;  %v252_v58 = vstv %s1877_s17 }
 0x285   :  { %vm253_vm9 = vcmp.eq.s32.totalorder %v3268_v32, %v252_v58 }
 0x286   :  { %2895 = vmatpush3.bf16.msra.mxu1 %v3602_v19  ;;  %v103_v19 = vstv %s99_s2  ;;  %s1885_s2 = sld [smem:[#allocation4 + $0xd]] }
 0x287   :  { %2897 = vmatprep.subr.bf16.mxu1 %v3618_v38 }
 0x28a   :  { %2899 = vmatpush3.bf16.msra.mxu1 %v3618_v38  ;;  %v104_v38 = vsel %vm102_vm0, %v103_v19, 0.0 }
 0x28b   :  { %2901 = vmatprep.subr.bf16.mxu1 %v3630_v45  ;;  %105 = vst [vmem:[#allocation3] sm:$0x1] %v104_v38 }
 0x28c   :  { %v284_v29 = vstv %s1885_s2 }
 0x28d   :  { %vm285_vm11 = vcmp.eq.s32.totalorder %v3268_v32, %v284_v29 }
 0x28e   :  { %2903 = vmatpush3.bf16.msra.mxu1 %v3630_v45  ;;  %v119_v45 = vstv %s115_s23  ;;  %s281_s23 = scalar_select %p280_p1, 1, 0 }
 0x28f   :  { %2905 = vmatprep.subr.bf16.mxu1 %v3696_v9 }
 0x290   :  { %s282_s4 = scvt.s32.f32 %s281_s23 }
 0x292   :  { %2907 = vmatpush3.bf16.msra.mxu1 %v3696_v9  ;;  %v133_v9 = vstv %s1851_s19  ;;  %s250_s19 = scvt.s32.f32 %s249_s15  ;;  %v286_v51 = vstv %s282_s4 }
 0x293   :  { %2909 = vmatprep.subr.bf16.mxu1 %v3700_v44  ;;  %vm134_vm2 = vcmp.eq.s32.totalorder %v3268_v32, %v133_v9  ;;  %v287_v34 = vsel %vm285_vm11, %v286_v51, 0.0 }
 0x294   :  { %v254_v56 = vstv %s250_s19  ;;  %288 = vst [vmem:[#allocation3 + $0xc] sm:$0x1] %v287_v34 }
 0x295   :  { %v255_v4 = vsel %vm253_vm9, %v254_v56, 0.0 }
 0x296   :  { %2911 = vmatpush3.bf16.msra.mxu1 %v3700_v44  ;;  %v120_v44 = vsel %vm118_vm1, %v119_v45, 0.0  ;;  %256 = vst [vmem:[#allocation3 + $0xa] sm:$0x1] %v255_v4 }
 0x297   :  { %2913 = vmatprep.subr.bf16.mxu1 %v3716_v23  ;;  %121 = vst [vmem:[#allocation3 + $0x1] sm:$0x1] %v120_v44 }
 0x29a   :  { %2915 = vmatpush3.bf16.msra.mxu1 %v3716_v23  ;;  %v135_v23 = vstv %s131_s24  ;;  %s298_s24 = scvt.s32.f32 %s297_s3 }
 0x29b   :  { %v136_v11 = vsel %vm134_vm2, %v135_v23, 0.0 }
 0x29c   :  { %137 = vst [vmem:[#allocation3 + $0x2] sm:$0x1] %v136_v11  ;;  %v302_v3 = vstv %s298_s24 }
 0x29d   :  { %2530 = vmatmul.mubr.f32.vlgmr.msra.gmra.mrb[0].mxu1 %v3809_v50  ;;  %v236_v50 = vstv %s3982_s16  ;;  %s265_s16 = scalar_select %p264_p0, 1, 0  ;;  %v303_v6 = vsel %vm301_vm12, %v302_v3, 0.0 }
 0x29e   :  { %vm237_vm7 = vcmp.eq.s32.totalorder %v3268_v32, %v236_v50  ;;  %304 = vst [vmem:[#allocation3 + $0xd] sm:$0x1] %v303_v6 }
 0x29f   :  { %v239_v43 = vsel %vm237_vm7, %v238_v40, 0.0  ;;  %s266_s21 = scvt.s32.f32 %s265_s16 }
 0x2a0   :  { %240 = vst [vmem:[#allocation3 + $0x9] sm:$0x1] %v239_v43 }
 0x2a1   :  { %v270_v7 = vstv %s266_s21 }
 0x2a2   :  { %v271_v52 = vsel %vm269_vm10, %v270_v7, 0.0 }
 0x2a3   :  { %272 = vst [vmem:[#allocation3 + $0xb] sm:$0x1] %v271_v52  ;;  %v1758_v48 = vld [vmem:[#allocation3] sm:$0xff] }
 0x2aa   :  { %v1759_v21 = vld [vmem:[#allocation3 + $0x8] sm:$0xff] }
 0x370   :  { %v2531_v30 = vpop.f32.mrb[0].mxu1 }
 0x371   :  { %1732 = vst [vmem:[#allocation16 + $0x8] sm:$0xff] %v2531_v30  ;;  %v1721_v10 = vpop.f32.mrb[1].mxu1  ;;  %v1780_v1 = vmul.f32 %v2531_v30, %v1759_v21  ;;  %v1737_v16 = vsel %vm1733_vm14, %v2531_v30, -1e+30 }
 0x372   :  { %v1779_v37 = vmul.f32 %v1758_v48, %v1721_v10  ;;  %1731 = vst [vmem:[#allocation16] sm:$0xff] %v1721_v10  ;;  %v1736_v22 = vsel %vm1733_vm14, %v1721_v10, -1e+30 }
 0x373   :  { %1738 = vmax.xlane.f32.xlu0 %v1736_v22 }
 0x374   :  { %v1781_v15 = vadd.f32 %v1780_v1, %v1779_v37 }
 0x377   :  { %1740 = vmax.xlane.f32.xlu0 %v1737_v16 }
 0x37b   :  { %1760 = vadd.xlane.f32.xlu0 %v1758_v48 }
 0x400   :  { %v1739_v12 = vpop.xlane.xlu0 %1738 }
 0x401   :  { %v1742_v57 = vsub.f32 %v1736_v22, %v1739_v12 }
 0x403   :  { %v1744_v14 = vmul.f32 1.442695, %v1742_v57 }
 0x404   :  { %v1741_v26 = vpop.xlane.xlu0 %1740 }
 0x405   :  { %v1743_v20 = vsub.f32 %v1737_v16, %v1741_v26  ;;  %2957 = vpow2.f32 %v1744_v14 }
 0x407   :  { %v1746_v13 = vmul.f32 1.442695, %v1743_v20 }
 0x408   :  { %v1761_v24 = vpop.xlane.xlu0 %1760 }
 0x409   :  { %2959 = vpow2.f32 %v1746_v13  ;;  %v1792_v53 = vsel %vm1766_vm15, %v1761_v24, 0.0 }
 0x40f   :  { %v2958_v32 = vpop.eup %2957 }
 0x410   :  { %1748 = vadd.xlane.f32.xlu1 %v2958_v32 }
 0x413   :  { %v2960_v25 = vpop.eup %2959 }
 0x414   :  { %1750 = vadd.xlane.f32.xlu1 %v2960_v25 }
 0x418   :  { %1762 = vadd.xlane.f32.xlu1 %v1759_v21 }
 0x41c   :  { %1782 = vadd.xlane.f32.xlu1 %v1781_v15 }
 0x49d   :  { %v1749_v18 = vpop.xlane.xlu1 %1748 }
 0x49e   :  { %2961 = vlog2.f32 %v1749_v18 }
 0x4a1   :  { %v1751_v61 = vpop.xlane.xlu1 %1750 }
 0x4a2   :  { %2963 = vlog2.f32 %v1751_v61 }
 0x4a5   :  { %v1763_v9 = vpop.xlane.xlu1 %1762 }
 0x4a6   :  { %v1793_v47 = vsel %vm1766_vm15, %v1763_v9, 0.0 }
 0x4a7   :  { %v1794_v54 = vadd.f32 %v1793_v47, %v1792_v53 }
 0x4a8   :  { %v2962_v63 = vpop.eup %2961 }
 0x4a9   :  { %v1753_v5 = vmul.f32 0.6931472, %v2962_v63  ;;  %v1783_v2 = vpop.xlane.xlu1 %1782 }
 0x4aa   :  { %v1784_v35 = vrot.slane %v1783_v2, 4 }
 0x4ab   :  { %v1756_v42 = vadd.f32 %v1753_v5, %v1739_v12 }
 0x4ac   :  { %v2964_v28 = vpop.eup %2963  ;;  %v1785_v62 = vadd.f32 %v1784_v35, %v1783_v2 }
 0x4ad   :  { %v1755_v19 = vmul.f32 0.6931472, %v2964_v28  ;;  %v1764_v45 = vmul.f32 %v1761_v24, %v1756_v42 }
 0x4ae   :  { %v1786_v55 = vrot.slane %v1785_v62, 2 }
 0x4af   :  { %v1757_v38 = vadd.f32 %v1755_v19, %v1741_v26  ;;  %v1767_v23 = vsel %vm1766_vm15, %v1764_v45, 0.0 }
 0x4b0   :  { %v1787_v41 = vadd.f32 %v1786_v55, %v1785_v62 }
 0x4b1   :  { %v1765_v44 = vmul.f32 %v1763_v9, %v1757_v38 }
 0x4b3   :  { %v1768_v11 = vsel %vm1766_vm15, %v1765_v44, 0.0 }
 0x4b4   :  { %v1769_v36 = vadd.f32 %v1768_v11, %v1767_v23 }
 0x4b6   :  { %1770 = vadd.xlane.f32.xlu0 %v1769_v36 }
 0x4ba   :  { %1795 = vadd.xlane.f32.xlu0 %v1794_v54 }
 0x543   :  { %v1771_v59 = vpop.xlane.xlu0 %1770 }
 0x544   :  { %v1772_v50 = vrot.slane %v1771_v59, 4 }
 0x546   :  { %v1773_v49 = vadd.f32 %v1772_v50, %v1771_v59 }
 0x547   :  { %v1796_v60 = vpop.xlane.xlu0 %1795 }
 0x548   :  { %v1774_v17 = vrot.slane %v1773_v49, 2  ;;  %v1797_v33 = vrot.slane %v1796_v60, 4 }
 0x549   :  { %3066 = shalt.err (!%p3063_p8)
}
 0x54a   :  { %s3067_s8 = scalar_lea.hbm %s4050_s6, 256 }
 0x54b   :  { %p3068_p9 = scmp.ne.s32.totalorder %s4050_s6, %s3067_s8  ;;  %p3071_p10 = scmp.lt.u32.totalorder %s3067_s8, %s4050_s6 }
 0x54d   :  { %p3073_p11 = pnand %p3071_p10, %p3068_p9 }
 0x54f   :  { %3076 = shalt.err (!%p3073_p11)
}
 0x550   :  { %1830 = dma.vmem_to_hbm [thread:$0]  %s1825_s29, 256, %s4050_s6, [#allocation6], %s3100_s1, %s3100_s1, %s3101_s10   ;;  %v1798_v39 = vadd.f32 %v1797_v33, %v1796_v60  ;;  %v1775_v40 = vadd.f32 %v1774_v17, %v1773_v49  ;;  %v1788_v43 = vrot.slane %v1787_v41, 1 }
 0x551   :  { %s3108_s19 = smov 1.0   ;;  %s3077_s23 = scalar_lea.hbm %s4049_s5, 16 }
 0x552   :  { %v1799_v58 = vrot.slane %v1798_v39, 2  ;;  %v1776_v56 = vrot.slane %v1775_v40, 1  ;;  %v1789_v46 = vadd.f32 %v1788_v43, %v1787_v41  ;;  %p3078_p12 = scmp.ne.s32.totalorder %s4049_s5, %s3077_s23  ;;  %p3081_p13 = scmp.lt.u32.totalorder %s3077_s23, %s4049_s5 }
 0x554   :  { %v1800_v4 = vadd.f32 %v1799_v58, %v1798_v39  ;;  %v1777_v7 = vadd.f32 %v1776_v56, %v1775_v40  ;;  %p3083_p0 = pnand %p3081_p13, %p3078_p12 }
 0x556   :  { %2938 = vpush %v1777_v7  ;;  %v1801_v51 = vrot.slane %v1800_v4, 1 }
 0x557   :  { %2940 = vpush %v1789_v46 }
 0x558   :  { %v1802_v52 = vadd.f32 %v1801_v51, %v1800_v4 }
 0x55a   :  { %2942 = vpush %v1802_v52 }
 0x587   :  { %s2939_s18 = spop %2938 }
 0x588   :  { %s2941_s15 = spop %2940 }
 0x589   :  { %s1791_s6 = ssub.f32 %s2939_s18, %s2941_s15 }
 0x58b   :  { %s2943_s16 = spop %2942 }
 0x58c   :  { %s1804_s20 = smax.f32 %s3108_s19, %s2943_s16 }
 0x58d   :  { %v1805_v29 = vstv %s1804_s20 }
 0x58e   :  { %2965 = vrcp.f32 %v1805_v29 }
 0x598   :  { %v2966_v34 = vpop.eup %2965 }
 0x599   :  { %2944 = vpush %v2966_v34 }
 0x5ca   :  { %s2945_s1 = spop %2944 }
 0x5cb   :  { %s1808_s10 = smul.f32 %s2945_s1, %s1791_s6 }
 0x5cd   :  { %1810 = sst [smem:[#allocation15]] %s1808_s10 }
 0x5ce   :  { %3086 = shalt.err (!%p3083_p0)
}
 0x5cf   :  { %s3109_s26 = smov [#allocation15]  }
 0x5d0   :  { %1818 = dma.smem_to_hbm %s3109_s26, 16, %s4049_s5, [#allocation8]  }
 0x5d1   :  { %3095 = dma.done.wait [#allocation8], 16  }
 0x5d2   :  { %3096 = vsyncadd [#allocation8], 4294967280 }
 0x5d3   :  { %3097 = dma.done.wait [#allocation6], 256  }
 0x5d4   :  { %3098 = vsyncadd [#allocation6], 4294967040 }
 0x5d5   :  { %1837 = sfence }
 0x5d6   :  { %1838 = vsyncpa [#allocation5], 1 }
 0x5d7   :  { %1839 = vsyncpa [#allocation13], 1 }
 0x5d8   :  { %1840 = vsyncpa [#allocation6], 1 }
 0x5d9   :  { %1841 = vsyncpa [#allocation7], 1 }
 0x5da   :  { %1842 = vsyncpa [#allocation8], 1 }
 0x5db   :  { %1843 = vsyncpa [#allocation9], 1 }

</bundles_post_ra>
